<compile_context>
chip_gen: v6e
topology: v6e:2x2x1
jax: 0.10.0
libtpu: 0.0.40
codegen_flags: <defaults>
</compile_context>

<pallas_src>
import jax
import jax.numpy as jnp
from jax.experimental import pallas as pl
from jax.experimental.pallas import tpu as pltpu

_VMEM = pl.BlockSpec(memory_space=pltpu.MemorySpace.VMEM)
_LANE = 128


# ---------------------------------------------------------------------------
# Host-side parameter folding / packing (done once).
# ---------------------------------------------------------------------------
def _conv1d_as_matmul(w, L):
    """Fold Conv1d(kernel=3, stride=1, padding=1) weight (Cout, Cin, 3) into a dense
    matrix M of shape (Cin*L, Cout*L) such that, for x flattened as
    xf[n, c*L + s] = x[n, c, s],   (xf @ M)[n, o*L + l] == conv1d(x)[n, o, l]."""
    Cout, Cin, K = w.shape
    s = jnp.arange(L)
    l = jnp.arange(L)
    dk = s[:, None] - l[None, :] + 1                       # x pos s feeds tap dk of out pos l
    valid = (dk >= 0) & (dk < K)
    gathered = w[:, :, jnp.clip(dk, 0, K - 1)]             # (Cout, Cin, L_s, L_l)
    band = jnp.where(valid[None, None, :, :], gathered, 0.0)
    return band.transpose(1, 2, 0, 3).reshape(Cin * L, Cout * L)   # rows (c,s), cols (o,l)


def pack_params(p):
    g = p['gru']
    H = g['whr'].shape[0]
    Dl = g['wmu'].shape[1]
    Dacs = p['ff_fwd_1']['w1'].shape[0] - Dl
    Dobs = p['ff_acs_1']['w1'].shape[0] - Dl
    Denc = p['ff_fwd_k']['w1'].shape[0] - Dl
    Ddec = p['ff_fwd_1']['w2'].shape[0]

    # --- GRU: gate-fused weights; fused mu|log_sigma head ----------------------------
    wi = jnp.concatenate([g['wir'], g['wiz'], g['win']], axis=1)          # (Din, 3H)
    bi = jnp.concatenate([g['b_ir'], g['b_iz'], g['b_in']], axis=1)       # (1, 3H)
    wh = jnp.concatenate([g['whr'], g['whz'], g['whn']], axis=1)          # (H, 3H)
    bh = jnp.concatenate([g['b_hr'], g['b_hz'], g['b_hn']], axis=1)
    wmuls = jnp.concatenate([g['wmu'], g['wls']], axis=1)                 # (H, 2*Dl)
    bmuls = jnp.concatenate([g['bmu'], g['bls']], axis=1)

    # --- conv encoders: fold convs to dense matrices, block-diagonalize future/past ---
    def fold_conv(c):
        L = c['wl'].shape[0] // c['w2'].shape[0]                          # = Dacs
        return (_conv1d_as_matmul(c['w1'], L), jnp.repeat(c['b1'], L)[None, :],
                _conv1d_as_matmul(c['w2'], L), jnp.repeat(c['b2'], L)[None, :],
                c['wl'], c['bl'])

    def blkdiag(a, b):
        top = jnp.concatenate([a, jnp.zeros((a.shape[0], b.shape[1]), jnp.float32)], axis=1)
        bot = jnp.concatenate([jnp.zeros((b.shape[0], a.shape[1]), jnp.float32), b], axis=1)
        return jnp.concatenate([top, bot], axis=0)

    fM1, fb1, fM2, fb2, fWL, fbl = fold_conv(p['conv_future'])
    pM1, pb1, pM2, pb2, pWL, pbl = fold_conv(p['conv_past'])
    cm1, cb1 = blkdiag(fM1, pM1), jnp.concatenate([fb1, pb1], axis=1)
    cm2, cb2 = blkdiag(fM2, pM2), jnp.concatenate([fb2, pb2], axis=1)
    cwl, cbl = blkdiag(fWL, pWL), jnp.concatenate([fbl, pbl], axis=1)

    # --- all 5 FFDO heads fused into ONE first-layer matmul + ONE block-diag second ---
    # ff_in row layout: [z_shift(Dl), mu_shift(Dl), z(Dl), acs(Dacs), enc_f(Denc),
    #                    enc_p(Denc), obs(Dobs)]
    heads = [p['ff_fwd_1'], p['ff_bwd_1'], p['ff_fwd_k'], p['ff_bwd_k'], p['ff_acs_1']]
    r_a = [0, 2 * Dl, 0, 2 * Dl, Dl]                                     # latent-part rows
    r_b = [3 * Dl, 3 * Dl, 3 * Dl + Dacs, 3 * Dl + Dacs + Denc,          # second-part rows
           3 * Dl + Dacs + 2 * Denc]
    Rff = 3 * Dl + Dacs + 2 * Denc + Dobs
    W1 = jnp.zeros((Rff, 5 * Ddec), jnp.float32)
    for i, hh in enumerate(heads):
        col = i * Ddec
        W1 = W1.at[r_a[i]:r_a[i] + Dl, col:col + Ddec].set(hh['w1'][:Dl])
        nb = hh['w1'].shape[0] - Dl
        W1 = W1.at[r_b[i]:r_b[i] + nb, col:col + Ddec].set(hh['w1'][Dl:])
    B1 = jnp.concatenate([hh['b1'] for hh in heads], axis=1)              # (1, 5*Ddec)

    outw = [hh['w2'].shape[1] for hh in heads]                            # Dobs x4, Dacs
    W2 = jnp.zeros((5 * Ddec, sum(outw)), jnp.float32)
    co = 0
    for i, hh in enumerate(heads):
        W2 = W2.at[i * Ddec:(i + 1) * Ddec, co:co + outw[i]].set(hh['w2'])
        co += outw[i]
    B2 = jnp.concatenate([hh['b2'] for hh in heads], axis=1)              # (1, 4*Dobs+Dacs)

    # --- single lane-dense weight slab ------------------------------------------------
    blocks = [('wi', wi, bi), ('wh', wh, bh), ('wmuls', wmuls, bmuls),
              ('cm1', cm1, cb1), ('cm2', cm2, cb2), ('cwl', cwl, cbl),
              ('ffw1', W1, B1), ('ffw2', W2, B2)]
    layout, col, rmax = {}, 0, 0
    for name, W, _ in blocks:
        rows, width = W.shape
        layout[name] = (rows, col, width)
        col += ((width + _LANE - 1) // _LANE) * _LANE       # 128-lane aligned blocks
        rmax = max(rmax, rows + 1)                          # +1 row for the bias
    slab = jnp.zeros((rmax, col), jnp.float32)
    for name, W, b in blocks:
        rows, c0, width = layout[name]
        slab = slab.at[0:rows, c0:c0 + width].set(W)
        slab = slab.at[rows:rows + 1, c0:c0 + width].set(b)

    dims = {'Dobs': Dobs, 'Dacs': Dacs, 'Dlatent': Dl, 'Dgru_hidden': H,
            'Din': wi.shape[0], 'Ddecoder': Ddec, 'Dacsencoding': Denc}
    return {'wslab': slab, 'layout': layout, 'dims': dims}


# ---------------------------------------------------------------------------
# Fused forward: factory closing over the static slab layout / dims.
# ---------------------------------------------------------------------------
def make_gruvae_forward(layout, dims):
    Dobs = dims['Dobs']; Dacs = dims['Dacs']; Dl = dims['Dlatent']
    H = dims['Dgru_hidden']; Din = dims['Din']
    n_pred = 4 * Dobs + Dacs
    f32 = jnp.float32

    def kernel(w_ref, act_ref, out_ref):
        T = act_ref.shape[0]

        def wb(name):
            rows, c0, width = layout[name]                  # static Python ints
            return (w_ref[0:rows, c0:c0 + width],           # weight
                    w_ref[rows:rows + 1, c0:c0 + width])    # bias (row below)

        def mm(a, b):
            return jnp.dot(a, b, preferred_element_type=f32)

        act = act_ref[...]                                  # (T, A) single load
        x_in = act[:, 0:Din]                                # [obs | acs]
        obs = act[:, 0:Dobs]
        acs = act[:, Dobs:Dobs + Dacs]
        eps = act[:, Dobs + Dacs:Dobs + Dacs + Dl]
        act_fp = act[:, Dobs + Dacs + Dl:]                  # [future_flat | past_flat]

        # ---------------- GRU (vreg-resident recurrence) ------------------------------
        wi, bi = wb('wi')
        wh, bh = wb('wh')
        xproj = mm(x_in, wi) + bi                           # hoisted input projection (T, 3H)
        h = jnp.zeros((1, H), f32)
        hs = []
        for t in range(T):                                  # static unroll, T is small
            xp = xproj[t:t + 1, :]
            hp = mm(h, wh) + bh                             # single MXU push per step
            rg = jax.nn.sigmoid(xp[:, 0:H] + hp[:, 0:H])
            zg = jax.nn.sigmoid(xp[:, H:2 * H] + hp[:, H:2 * H])
            ng = jnp.tanh(xp[:, 2 * H:3 * H] + rg * hp[:, 2 * H:3 * H])
            h = (1.0 - zg) * ng + zg * h
            hs.append(h)
        h_all = jnp.concatenate(hs, axis=0)                 # (T, H)

        # ---------------- fused mu | log_sigma head -----------------------------------
        wmuls, bmuls = wb('wmuls')
        muls = mm(h_all, wmuls) + bmuls                     # (T, 2*Dl) = [mu | log_sigma]
        mu = muls[:, 0:Dl]
        ls = muls[:, Dl:2 * Dl]
        z = mu + eps * jnp.exp(0.5 * ls)

        # ---------------- zero_pad(x)[:-1] time shift (sublane path, no MXU) ----------
        zm = jnp.concatenate([z, mu], axis=1)               # shift z & mu together
        zm_shift = jnp.concatenate(
            [jnp.zeros((1, 2 * Dl), f32), zm[0:T - 1, :]], axis=0)

        # ---------------- both conv encoders in 3 block-diag matmuls ------------------
        cm1, cb1 = wb('cm1'); cm2, cb2 = wb('cm2'); cwl, cbl = wb('cwl')
        a1 = jnp.maximum(mm(act_fp, cm1) + cb1, 0.0)
        a2 = jnp.maximum(mm(a1, cm2) + cb2, 0.0)
        enc_fp = mm(a2, cwl) + cbl                          # (T, 2*Denc) = [enc_f | enc_p]

        # ---------------- all 5 FFDO heads in 2 matmuls --------------------------------
        w1, b1 = wb('ffw1'); w2, b2 = wb('ffw2')
        ff_in = jnp.concatenate([zm_shift, z, acs, enc_fp, obs], axis=1)   # (T, Rff)
        hid = jnp.maximum(mm(ff_in, w1) + b1, 0.0)          # (T, 5*Ddec)
        preds = mm(hid, w2) + b2                            # (T, 4*Dobs + Dacs)

        # ---------------- single lane-packed output store ------------------------------
        out_ref[...] = jnp.concatenate([muls, preds, h_all], axis=1)

    def forward(wslab, obs, acs, future_acs, past_acs, eps):
        T = obs.shape[0]
        act = jnp.concatenate(
            [obs, acs, eps, future_acs.reshape(T, -1), past_acs.reshape(T, -1)],
            axis=1).astype(f32)
        o_tot = 2 * Dl + n_pred + H

        flops = sum(2 * T * rows * width for rows, _, width in layout.values())
        cost = pl.CostEstimate(
            flops=int(flops),
            transcendentals=int(T * (3 * H + Dl)),
            bytes_accessed=int(4 * (wslab.size + act.size + T * o_tot)))

        out = pl.pallas_call(
            kernel,
            out_shape=jax.ShapeDtypeStruct((T, o_tot), f32),
            in_specs=[_VMEM, _VMEM],
            out_specs=_VMEM,
            cost_estimate=cost,
        )(wslab, act)

        mu = out[:, 0:Dl]
        log_sigma = out[:, Dl:2 * Dl]
        po = 2 * Dl
        pred = {
            'obs_one_fwd': out[:, po:po + Dobs],
            'obs_one_bwd': out[:, po + Dobs:po + 2 * Dobs],
            'obs_k_fwd':   out[:, po + 2 * Dobs:po + 3 * Dobs],
            'obs_k_bwd':   out[:, po + 3 * Dobs:po + 4 * Dobs],
            'acs_1_fwd':   out[:, po + 4 * Dobs:po + 4 * Dobs + Dacs],
        }
        hn = out[T - 1:T, po + n_pred:po + n_pred + H]
        return pred, mu, log_sigma, hn

    return jax.jit(forward)


# ---------------------------------------------------------------------------
# Deterministic synthetic parameter init (shapes follow the module __init__).
# Dense weights stored pre-transposed as (in_dim, out_dim).
# ---------------------------------------------------------------------------
def init_params(key, Dacs, Dacsencoding, Dobs, Dlatent, Dgru_hidden, Ddecoder, k,
                acs_feedback=True):
    keys = iter(jax.random.split(key, 128))

    def nrm(shape, scale=0.1):
        return scale * jax.random.normal(next(keys), shape, dtype=jnp.float32)

    Din = (Dobs + Dacs) if acs_feedback else Dobs
    H = Dgru_hidden
    gru = {
        'wir': nrm((Din, H)), 'wiz': nrm((Din, H)), 'win': nrm((Din, H)),
        'whr': nrm((H, H)), 'whz': nrm((H, H)), 'whn': nrm((H, H)),
        'b_ir': nrm((1, H)), 'b_iz': nrm((1, H)), 'b_in': nrm((1, H)),
        'b_hr': nrm((1, H)), 'b_hz': nrm((1, H)), 'b_hn': nrm((1, H)),
        'wmu': nrm((H, Dlatent)), 'bmu': nrm((1, Dlatent)),
        'wls': nrm((H, Dlatent)), 'bls': nrm((1, Dlatent)),
    }

    def make_ffdo(din, dout):
        return {'w1': nrm((din, Ddecoder)), 'b1': nrm((1, Ddecoder)),
                'w2': nrm((Ddecoder, dout)), 'b2': nrm((1, dout))}

    def make_conv_enc():
        nf = 5  # num_filters1 == num_filters2 == 5
        return {'w1': nrm((nf, k + 1, 3)), 'b1': nrm((nf,)),
                'w2': nrm((nf, nf, 3)), 'b2': nrm((nf,)),
                'wl': nrm((nf * Dacs, Dacsencoding)), 'bl': nrm((1, Dacsencoding))}

    return {
        'gru': gru,
        'conv_future': make_conv_enc(),
        'conv_past': make_conv_enc(),
        'ff_fwd_1': make_ffdo(Dlatent + Dacs, Dobs),
        'ff_bwd_1': make_ffdo(Dlatent + Dacs, Dobs),
        'ff_fwd_k': make_ffdo(Dlatent + Dacsencoding, Dobs),
        'ff_bwd_k': make_ffdo(Dlatent + Dacsencoding, Dobs),
        'ff_acs_1': make_ffdo(Dlatent + Dobs, Dacs),
    }


# ---------------------------------------------------------------------------
# Pure-JAX reference (un-fused weights) for validation.
# ---------------------------------------------------------------------------
def _reference_forward(params, obs, acs, future_acs, past_acs, eps, acs_feedback=True):
    g = params['gru']
    x = jnp.concatenate([obs, acs], axis=-1) if acs_feedback else obs
    T = x.shape[0]
    H = g['whr'].shape[0]
    h = jnp.zeros((1, H), jnp.float32)
    hs = []
    for t in range(T):
        xt = x[t:t + 1]
        r = jax.nn.sigmoid(xt @ g['wir'] + g['b_ir'] + h @ g['whr'] + g['b_hr'])
        zg = jax.nn.sigmoid(xt @ g['wiz'] + g['b_iz'] + h @ g['whz'] + g['b_hz'])
        n = jnp.tanh(xt @ g['win'] + g['b_in'] + r * (h @ g['whn'] + g['b_hn']))
        h = (1.0 - zg) * n + zg * h
        hs.append(h)
    h_all = jnp.concatenate(hs, axis=0)
    mu = h_all @ g['wmu'] + g['bmu']
    ls = h_all @ g['wls'] + g['bls']
    z = mu + eps * jnp.exp(0.5 * ls)
    zero = jnp.zeros((1, mu.shape[1]), jnp.float32)
    z_shift = jnp.concatenate([zero, z[:-1]], axis=0)
    mu_shift = jnp.concatenate([zero, mu[:-1]], axis=0)

    def conv1d(xin, w, b):  # torch Conv1d(k=3, stride=1, padding=1)
        L = xin.shape[2]
        xp = jnp.pad(xin, ((0, 0), (0, 0), (1, 1)))
        cols = [jnp.einsum('ncd,ocd->no', xp[:, :, l:l + 3], w) + b for l in range(L)]
        return jnp.stack(cols, axis=-1)

    def conv_encode(cp, xin):
        a1 = jax.nn.relu(conv1d(xin, cp['w1'], cp['b1']))
        a2 = jax.nn.relu(conv1d(a1, cp['w2'], cp['b2']))
        return a2.reshape(a2.shape[0], -1) @ cp['wl'] + cp['bl']

    def ffdo(hp, xin):
        return jax.nn.relu(xin @ hp['w1'] + hp['b1']) @ hp['w2'] + hp['b2']

    enc_f = conv_encode(params['conv_future'], future_acs)
    enc_p = conv_encode(params['conv_past'], past_acs)
    pred = {
        'obs_one_fwd': ffdo(params['ff_fwd_1'], jnp.concatenate([z_shift, acs], axis=1)),
        'obs_one_bwd': ffdo(params['ff_bwd_1'], jnp.concatenate([z, acs], axis=1)),
        'obs_k_fwd': ffdo(params['ff_fwd_k'], jnp.concatenate([z_shift, enc_f], axis=1)),
        'obs_k_bwd': ffdo(params['ff_bwd_k'], jnp.concatenate([z, enc_p], axis=1)),
        'acs_1_fwd': ffdo(params['ff_acs_1'], jnp.concatenate([mu_shift, obs], axis=1)),
    }
    return pred, mu, ls, h


if __name__ == "__main__":
    Dacs, Dacsencoding, Dobs = 4, 8, 6
    Dlatent, Dgru_hidden, Ddecoder, k = 5, 16, 16, 3
    T = 8  # sequence length (leading / "batch" axis)

    root = jax.random.PRNGKey(0)
    kp, ko, ka, kf, kpa, ke = jax.random.split(root, 6)

    params = init_params(kp, Dacs, Dacsencoding, Dobs, Dlatent,
                         Dgru_hidden, Ddecoder, k, acs_feedback=True)
    packed = pack_params(params)

    obs = jax.random.normal(ko, (T, Dobs), dtype=jnp.float32)
    acs = jax.random.normal(ka, (T, Dacs), dtype=jnp.float32)
    future_acs = jax.random.normal(kf, (T, k + 1, Dacs), dtype=jnp.float32)
    past_acs = jax.random.normal(kpa, (T, k + 1, Dacs), dtype=jnp.float32)
    eps = jax.random.normal(ke, (T, Dlatent), dtype=jnp.float32)  # stands in for torch.randn

    forward = make_gruvae_forward(packed['layout'], packed['dims'])
    pred, mu, log_sigma, hn = forward(packed['wslab'], obs, acs, future_acs, past_acs, eps)
    jax.block_until_ready((pred, mu, log_sigma, hn))

    # shape checks
    assert mu.shape == (T, Dlatent) and log_sigma.shape == (T, Dlatent)
    assert hn.shape == (1, Dgru_hidden)
    assert pred['obs_one_fwd'].shape == (T, Dobs)
    assert pred['obs_one_bwd'].shape == (T, Dobs)
    assert pred['obs_k_fwd'].shape == (T, Dobs)
    assert pred['obs_k_bwd'].shape == (T, Dobs)
    assert pred['acs_1_fwd'].shape == (T, Dacs)

    # numerical check against the un-fused pure-JAX reference (full-f32 matmuls)
    with jax.default_matmul_precision("highest"):
        ref_pred, ref_mu, ref_ls, ref_hn = _reference_forward(
            params, obs, acs, future_acs, past_acs, eps)
    tol = dict(rtol=1e-4, atol=2e-5)   # tightened from 2e-2 (all-f32 path)
    assert jnp.allclose(mu, ref_mu, **tol)
    assert jnp.allclose(log_sigma, ref_ls, **tol)
    assert jnp.allclose(hn, ref_hn, **tol)
    for name in pred:
        assert jnp.allclose(pred[name], ref_pred[name], **tol), name

    print("KERNEL_OK")
</pallas_src>

<mosaic_0001>
module attributes {stable_mosaic.version = 11 : i64} {
  func.func @kernel(%arg0: memref<81x1024xf32, #tpu.memory_space<vmem>>, %arg1: memref<8x47xf32, #tpu.memory_space<vmem>>, %arg2: memref<8x54xf32, #tpu.memory_space<vmem>>) attributes {dimension_semantics = [], scalar_prefetch = 0 : i64, scratch_operands = 0 : i64, tpu.core_type = #tpu.core_type<tc>} {
    %c0 = arith.constant 0 : index
    %c0_0 = arith.constant 0 : index
    %0 = vector.load %arg1[%c0, %c0_0] : memref<8x47xf32, #tpu.memory_space<vmem>>, vector<8x47xf32>
    %1 = vector.extract_strided_slice %0 {offsets = [0, 0], sizes = [8, 10], strides = [1, 1]} : vector<8x47xf32> to vector<8x10xf32>
    %2 = vector.extract_strided_slice %0 {offsets = [0, 0], sizes = [8, 6], strides = [1, 1]} : vector<8x47xf32> to vector<8x6xf32>
    %3 = vector.extract_strided_slice %0 {offsets = [0, 6], sizes = [8, 4], strides = [1, 1]} : vector<8x47xf32> to vector<8x4xf32>
    %4 = vector.extract_strided_slice %0 {offsets = [0, 10], sizes = [8, 5], strides = [1, 1]} : vector<8x47xf32> to vector<8x5xf32>
    %5 = vector.extract_strided_slice %0 {offsets = [0, 15], sizes = [8, 32], strides = [1, 1]} : vector<8x47xf32> to vector<8x32xf32>
    %c0_1 = arith.constant 0 : index
    %c0_2 = arith.constant 0 : index
    %6 = vector.load %arg0[%c0_1, %c0_2] : memref<81x1024xf32, #tpu.memory_space<vmem>>, vector<10x48xf32>
    %c10 = arith.constant 10 : index
    %c0_3 = arith.constant 0 : index
    %7 = vector.load %arg0[%c10, %c0_3] : memref<81x1024xf32, #tpu.memory_space<vmem>>, vector<1x48xf32>
    %c0_4 = arith.constant 0 : index
    %c128 = arith.constant 128 : index
    %8 = vector.load %arg0[%c0_4, %c128] : memref<81x1024xf32, #tpu.memory_space<vmem>>, vector<16x48xf32>
    %c16 = arith.constant 16 : index
    %c128_5 = arith.constant 128 : index
    %9 = vector.load %arg0[%c16, %c128_5] : memref<81x1024xf32, #tpu.memory_space<vmem>>, vector<1x48xf32>
    %cst = arith.constant dense<0.000000e+00> : vector<8x48xf32>
    %10 = tpu.matmul %1, %6, %cst {dimension_numbers = #tpu.dot_dimension_numbers<[1], [0], [0], [1], [0, 0, 1, 1], [], []>} : vector<8x10xf32>, vector<10x48xf32>, vector<8x48xf32> -> vector<8x48xf32>
    %11 = vector.broadcast %7 : vector<1x48xf32> to vector<8x48xf32>
    %12 = arith.addf %10, %11 : vector<8x48xf32>
    %cst_6 = arith.constant 0.000000e+00 : f32
    %13 = vector.broadcast %cst_6 : f32 to vector<1x16xf32>
    %14 = vector.extract_strided_slice %12 {offsets = [0, 0], sizes = [1, 48], strides = [1, 1]} : vector<8x48xf32> to vector<1x48xf32>
    %cst_7 = arith.constant dense<0.000000e+00> : vector<1x48xf32>
    %15 = tpu.matmul %13, %8, %cst_7 {dimension_numbers = #tpu.dot_dimension_numbers<[1], [0], [0], [1], [0, 0, 1, 1], [], []>} : vector<1x16xf32>, vector<16x48xf32>, vector<1x48xf32> -> vector<1x48xf32>
    %16 = arith.addf %15, %9 : vector<1x48xf32>
    %17 = vector.extract_strided_slice %14 {offsets = [0, 0], sizes = [1, 16], strides = [1, 1]} : vector<1x48xf32> to vector<1x16xf32>
    %18 = vector.extract_strided_slice %16 {offsets = [0, 0], sizes = [1, 16], strides = [1, 1]} : vector<1x48xf32> to vector<1x16xf32>
    %19 = arith.addf %17, %18 : vector<1x16xf32>
    %20 = arith.negf %19 : vector<1x16xf32>
    %21 = math.exp %20 : vector<1x16xf32>
    %cst_8 = arith.constant 1.000000e+00 : f32
    %22 = vector.broadcast %cst_8 : f32 to vector<1x16xf32>
    %23 = arith.addf %22, %21 : vector<1x16xf32>
    %24 = arith.divf %22, %23 : vector<1x16xf32>
    %25 = vector.extract_strided_slice %14 {offsets = [0, 16], sizes = [1, 16], strides = [1, 1]} : vector<1x48xf32> to vector<1x16xf32>
    %26 = vector.extract_strided_slice %16 {offsets = [0, 16], sizes = [1, 16], strides = [1, 1]} : vector<1x48xf32> to vector<1x16xf32>
    %27 = arith.addf %25, %26 : vector<1x16xf32>
    %28 = arith.negf %27 : vector<1x16xf32>
    %29 = math.exp %28 : vector<1x16xf32>
    %cst_9 = arith.constant 1.000000e+00 : f32
    %30 = vector.broadcast %cst_9 : f32 to vector<1x16xf32>
    %31 = arith.addf %30, %29 : vector<1x16xf32>
    %32 = arith.divf %30, %31 : vector<1x16xf32>
    %33 = vector.extract_strided_slice %14 {offsets = [0, 32], sizes = [1, 16], strides = [1, 1]} : vector<1x48xf32> to vector<1x16xf32>
    %34 = vector.extract_strided_slice %16 {offsets = [0, 32], sizes = [1, 16], strides = [1, 1]} : vector<1x48xf32> to vector<1x16xf32>
    %35 = arith.mulf %24, %34 : vector<1x16xf32>
    %36 = arith.addf %33, %35 : vector<1x16xf32>
    %37 = math.tanh %36 : vector<1x16xf32>
    %cst_10 = arith.constant 1.000000e+00 : f32
    %38 = vector.broadcast %cst_10 : f32 to vector<1x16xf32>
    %39 = arith.subf %38, %32 : vector<1x16xf32>
    %40 = arith.mulf %39, %37 : vector<1x16xf32>
    %41 = arith.mulf %32, %13 : vector<1x16xf32>
    %42 = arith.addf %40, %41 : vector<1x16xf32>
    %43 = vector.extract_strided_slice %12 {offsets = [1, 0], sizes = [1, 48], strides = [1, 1]} : vector<8x48xf32> to vector<1x48xf32>
    %cst_11 = arith.constant dense<0.000000e+00> : vector<1x48xf32>
    %44 = tpu.matmul %42, %8, %cst_11 {dimension_numbers = #tpu.dot_dimension_numbers<[1], [0], [0], [1], [0, 0, 1, 1], [], []>} : vector<1x16xf32>, vector<16x48xf32>, vector<1x48xf32> -> vector<1x48xf32>
    %45 = arith.addf %44, %9 : vector<1x48xf32>
    %46 = vector.extract_strided_slice %43 {offsets = [0, 0], sizes = [1, 16], strides = [1, 1]} : vector<1x48xf32> to vector<1x16xf32>
    %47 = vector.extract_strided_slice %45 {offsets = [0, 0], sizes = [1, 16], strides = [1, 1]} : vector<1x48xf32> to vector<1x16xf32>
    %48 = arith.addf %46, %47 : vector<1x16xf32>
    %49 = arith.negf %48 : vector<1x16xf32>
    %50 = math.exp %49 : vector<1x16xf32>
    %cst_12 = arith.constant 1.000000e+00 : f32
    %51 = vector.broadcast %cst_12 : f32 to vector<1x16xf32>
    %52 = arith.addf %51, %50 : vector<1x16xf32>
    %53 = arith.divf %51, %52 : vector<1x16xf32>
    %54 = vector.extract_strided_slice %43 {offsets = [0, 16], sizes = [1, 16], strides = [1, 1]} : vector<1x48xf32> to vector<1x16xf32>
    %55 = vector.extract_strided_slice %45 {offsets = [0, 16], sizes = [1, 16], strides = [1, 1]} : vector<1x48xf32> to vector<1x16xf32>
    %56 = arith.addf %54, %55 : vector<1x16xf32>
    %57 = arith.negf %56 : vector<1x16xf32>
    %58 = math.exp %57 : vector<1x16xf32>
    %cst_13 = arith.constant 1.000000e+00 : f32
    %59 = vector.broadcast %cst_13 : f32 to vector<1x16xf32>
    %60 = arith.addf %59, %58 : vector<1x16xf32>
    %61 = arith.divf %59, %60 : vector<1x16xf32>
    %62 = vector.extract_strided_slice %43 {offsets = [0, 32], sizes = [1, 16], strides = [1, 1]} : vector<1x48xf32> to vector<1x16xf32>
    %63 = vector.extract_strided_slice %45 {offsets = [0, 32], sizes = [1, 16], strides = [1, 1]} : vector<1x48xf32> to vector<1x16xf32>
    %64 = arith.mulf %53, %63 : vector<1x16xf32>
    %65 = arith.addf %62, %64 : vector<1x16xf32>
    %66 = math.tanh %65 : vector<1x16xf32>
    %cst_14 = arith.constant 1.000000e+00 : f32
    %67 = vector.broadcast %cst_14 : f32 to vector<1x16xf32>
    %68 = arith.subf %67, %61 : vector<1x16xf32>
    %69 = arith.mulf %68, %66 : vector<1x16xf32>
    %70 = arith.mulf %61, %42 : vector<1x16xf32>
    %71 = arith.addf %69, %70 : vector<1x16xf32>
    %72 = vector.extract_strided_slice %12 {offsets = [2, 0], sizes = [1, 48], strides = [1, 1]} : vector<8x48xf32> to vector<1x48xf32>
    %cst_15 = arith.constant dense<0.000000e+00> : vector<1x48xf32>
    %73 = tpu.matmul %71, %8, %cst_15 {dimension_numbers = #tpu.dot_dimension_numbers<[1], [0], [0], [1], [0, 0, 1, 1], [], []>} : vector<1x16xf32>, vector<16x48xf32>, vector<1x48xf32> -> vector<1x48xf32>
    %74 = arith.addf %73, %9 : vector<1x48xf32>
    %75 = vector.extract_strided_slice %72 {offsets = [0, 0], sizes = [1, 16], strides = [1, 1]} : vector<1x48xf32> to vector<1x16xf32>
    %76 = vector.extract_strided_slice %74 {offsets = [0, 0], sizes = [1, 16], strides = [1, 1]} : vector<1x48xf32> to vector<1x16xf32>
    %77 = arith.addf %75, %76 : vector<1x16xf32>
    %78 = arith.negf %77 : vector<1x16xf32>
    %79 = math.exp %78 : vector<1x16xf32>
    %cst_16 = arith.constant 1.000000e+00 : f32
    %80 = vector.broadcast %cst_16 : f32 to vector<1x16xf32>
    %81 = arith.addf %80, %79 : vector<1x16xf32>
    %82 = arith.divf %80, %81 : vector<1x16xf32>
    %83 = vector.extract_strided_slice %72 {offsets = [0, 16], sizes = [1, 16], strides = [1, 1]} : vector<1x48xf32> to vector<1x16xf32>
    %84 = vector.extract_strided_slice %74 {offsets = [0, 16], sizes = [1, 16], strides = [1, 1]} : vector<1x48xf32> to vector<1x16xf32>
    %85 = arith.addf %83, %84 : vector<1x16xf32>
    %86 = arith.negf %85 : vector<1x16xf32>
    %87 = math.exp %86 : vector<1x16xf32>
    %cst_17 = arith.constant 1.000000e+00 : f32
    %88 = vector.broadcast %cst_17 : f32 to vector<1x16xf32>
    %89 = arith.addf %88, %87 : vector<1x16xf32>
    %90 = arith.divf %88, %89 : vector<1x16xf32>
    %91 = vector.extract_strided_slice %72 {offsets = [0, 32], sizes = [1, 16], strides = [1, 1]} : vector<1x48xf32> to vector<1x16xf32>
    %92 = vector.extract_strided_slice %74 {offsets = [0, 32], sizes = [1, 16], strides = [1, 1]} : vector<1x48xf32> to vector<1x16xf32>
    %93 = arith.mulf %82, %92 : vector<1x16xf32>
    %94 = arith.addf %91, %93 : vector<1x16xf32>
    %95 = math.tanh %94 : vector<1x16xf32>
    %cst_18 = arith.constant 1.000000e+00 : f32
    %96 = vector.broadcast %cst_18 : f32 to vector<1x16xf32>
    %97 = arith.subf %96, %90 : vector<1x16xf32>
    %98 = arith.mulf %97, %95 : vector<1x16xf32>
    %99 = arith.mulf %90, %71 : vector<1x16xf32>
    %100 = arith.addf %98, %99 : vector<1x16xf32>
    %101 = vector.extract_strided_slice %12 {offsets = [3, 0], sizes = [1, 48], strides = [1, 1]} : vector<8x48xf32> to vector<1x48xf32>
    %cst_19 = arith.constant dense<0.000000e+00> : vector<1x48xf32>
    %102 = tpu.matmul %100, %8, %cst_19 {dimension_numbers = #tpu.dot_dimension_numbers<[1], [0], [0], [1], [0, 0, 1, 1], [], []>} : vector<1x16xf32>, vector<16x48xf32>, vector<1x48xf32> -> vector<1x48xf32>
    %103 = arith.addf %102, %9 : vector<1x48xf32>
    %104 = vector.extract_strided_slice %101 {offsets = [0, 0], sizes = [1, 16], strides = [1, 1]} : vector<1x48xf32> to vector<1x16xf32>
    %105 = vector.extract_strided_slice %103 {offsets = [0, 0], sizes = [1, 16], strides = [1, 1]} : vector<1x48xf32> to vector<1x16xf32>
    %106 = arith.addf %104, %105 : vector<1x16xf32>
    %107 = arith.negf %106 : vector<1x16xf32>
    %108 = math.exp %107 : vector<1x16xf32>
    %cst_20 = arith.constant 1.000000e+00 : f32
    %109 = vector.broadcast %cst_20 : f32 to vector<1x16xf32>
    %110 = arith.addf %109, %108 : vector<1x16xf32>
    %111 = arith.divf %109, %110 : vector<1x16xf32>
    %112 = vector.extract_strided_slice %101 {offsets = [0, 16], sizes = [1, 16], strides = [1, 1]} : vector<1x48xf32> to vector<1x16xf32>
    %113 = vector.extract_strided_slice %103 {offsets = [0, 16], sizes = [1, 16], strides = [1, 1]} : vector<1x48xf32> to vector<1x16xf32>
    %114 = arith.addf %112, %113 : vector<1x16xf32>
    %115 = arith.negf %114 : vector<1x16xf32>
    %116 = math.exp %115 : vector<1x16xf32>
    %cst_21 = arith.constant 1.000000e+00 : f32
    %117 = vector.broadcast %cst_21 : f32 to vector<1x16xf32>
    %118 = arith.addf %117, %116 : vector<1x16xf32>
    %119 = arith.divf %117, %118 : vector<1x16xf32>
    %120 = vector.extract_strided_slice %101 {offsets = [0, 32], sizes = [1, 16], strides = [1, 1]} : vector<1x48xf32> to vector<1x16xf32>
    %121 = vector.extract_strided_slice %103 {offsets = [0, 32], sizes = [1, 16], strides = [1, 1]} : vector<1x48xf32> to vector<1x16xf32>
    %122 = arith.mulf %111, %121 : vector<1x16xf32>
    %123 = arith.addf %120, %122 : vector<1x16xf32>
    %124 = math.tanh %123 : vector<1x16xf32>
    %cst_22 = arith.constant 1.000000e+00 : f32
    %125 = vector.broadcast %cst_22 : f32 to vector<1x16xf32>
    %126 = arith.subf %125, %119 : vector<1x16xf32>
    %127 = arith.mulf %126, %124 : vector<1x16xf32>
    %128 = arith.mulf %119, %100 : vector<1x16xf32>
    %129 = arith.addf %127, %128 : vector<1x16xf32>
    %130 = vector.extract_strided_slice %12 {offsets = [4, 0], sizes = [1, 48], strides = [1, 1]} : vector<8x48xf32> to vector<1x48xf32>
    %cst_23 = arith.constant dense<0.000000e+00> : vector<1x48xf32>
    %131 = tpu.matmul %129, %8, %cst_23 {dimension_numbers = #tpu.dot_dimension_numbers<[1], [0], [0], [1], [0, 0, 1, 1], [], []>} : vector<1x16xf32>, vector<16x48xf32>, vector<1x48xf32> -> vector<1x48xf32>
    %132 = arith.addf %131, %9 : vector<1x48xf32>
    %133 = vector.extract_strided_slice %130 {offsets = [0, 0], sizes = [1, 16], strides = [1, 1]} : vector<1x48xf32> to vector<1x16xf32>
    %134 = vector.extract_strided_slice %132 {offsets = [0, 0], sizes = [1, 16], strides = [1, 1]} : vector<1x48xf32> to vector<1x16xf32>
    %135 = arith.addf %133, %134 : vector<1x16xf32>
    %136 = arith.negf %135 : vector<1x16xf32>
    %137 = math.exp %136 : vector<1x16xf32>
    %cst_24 = arith.constant 1.000000e+00 : f32
    %138 = vector.broadcast %cst_24 : f32 to vector<1x16xf32>
    %139 = arith.addf %138, %137 : vector<1x16xf32>
    %140 = arith.divf %138, %139 : vector<1x16xf32>
    %141 = vector.extract_strided_slice %130 {offsets = [0, 16], sizes = [1, 16], strides = [1, 1]} : vector<1x48xf32> to vector<1x16xf32>
    %142 = vector.extract_strided_slice %132 {offsets = [0, 16], sizes = [1, 16], strides = [1, 1]} : vector<1x48xf32> to vector<1x16xf32>
    %143 = arith.addf %141, %142 : vector<1x16xf32>
    %144 = arith.negf %143 : vector<1x16xf32>
    %145 = math.exp %144 : vector<1x16xf32>
    %cst_25 = arith.constant 1.000000e+00 : f32
    %146 = vector.broadcast %cst_25 : f32 to vector<1x16xf32>
    %147 = arith.addf %146, %145 : vector<1x16xf32>
    %148 = arith.divf %146, %147 : vector<1x16xf32>
    %149 = vector.extract_strided_slice %130 {offsets = [0, 32], sizes = [1, 16], strides = [1, 1]} : vector<1x48xf32> to vector<1x16xf32>
    %150 = vector.extract_strided_slice %132 {offsets = [0, 32], sizes = [1, 16], strides = [1, 1]} : vector<1x48xf32> to vector<1x16xf32>
    %151 = arith.mulf %140, %150 : vector<1x16xf32>
    %152 = arith.addf %149, %151 : vector<1x16xf32>
    %153 = math.tanh %152 : vector<1x16xf32>
    %cst_26 = arith.constant 1.000000e+00 : f32
    %154 = vector.broadcast %cst_26 : f32 to vector<1x16xf32>
    %155 = arith.subf %154, %148 : vector<1x16xf32>
    %156 = arith.mulf %155, %153 : vector<1x16xf32>
    %157 = arith.mulf %148, %129 : vector<1x16xf32>
    %158 = arith.addf %156, %157 : vector<1x16xf32>
    %159 = vector.extract_strided_slice %12 {offsets = [5, 0], sizes = [1, 48], strides = [1, 1]} : vector<8x48xf32> to vector<1x48xf32>
    %cst_27 = arith.constant dense<0.000000e+00> : vector<1x48xf32>
    %160 = tpu.matmul %158, %8, %cst_27 {dimension_numbers = #tpu.dot_dimension_numbers<[1], [0], [0], [1], [0, 0, 1, 1], [], []>} : vector<1x16xf32>, vector<16x48xf32>, vector<1x48xf32> -> vector<1x48xf32>
    %161 = arith.addf %160, %9 : vector<1x48xf32>
    %162 = vector.extract_strided_slice %159 {offsets = [0, 0], sizes = [1, 16], strides = [1, 1]} : vector<1x48xf32> to vector<1x16xf32>
    %163 = vector.extract_strided_slice %161 {offsets = [0, 0], sizes = [1, 16], strides = [1, 1]} : vector<1x48xf32> to vector<1x16xf32>
    %164 = arith.addf %162, %163 : vector<1x16xf32>
    %165 = arith.negf %164 : vector<1x16xf32>
    %166 = math.exp %165 : vector<1x16xf32>
    %cst_28 = arith.constant 1.000000e+00 : f32
    %167 = vector.broadcast %cst_28 : f32 to vector<1x16xf32>
    %168 = arith.addf %167, %166 : vector<1x16xf32>
    %169 = arith.divf %167, %168 : vector<1x16xf32>
    %170 = vector.extract_strided_slice %159 {offsets = [0, 16], sizes = [1, 16], strides = [1, 1]} : vector<1x48xf32> to vector<1x16xf32>
    %171 = vector.extract_strided_slice %161 {offsets = [0, 16], sizes = [1, 16], strides = [1, 1]} : vector<1x48xf32> to vector<1x16xf32>
    %172 = arith.addf %170, %171 : vector<1x16xf32>
    %173 = arith.negf %172 : vector<1x16xf32>
    %174 = math.exp %173 : vector<1x16xf32>
    %cst_29 = arith.constant 1.000000e+00 : f32
    %175 = vector.broadcast %cst_29 : f32 to vector<1x16xf32>
    %176 = arith.addf %175, %174 : vector<1x16xf32>
    %177 = arith.divf %175, %176 : vector<1x16xf32>
    %178 = vector.extract_strided_slice %159 {offsets = [0, 32], sizes = [1, 16], strides = [1, 1]} : vector<1x48xf32> to vector<1x16xf32>
    %179 = vector.extract_strided_slice %161 {offsets = [0, 32], sizes = [1, 16], strides = [1, 1]} : vector<1x48xf32> to vector<1x16xf32>
    %180 = arith.mulf %169, %179 : vector<1x16xf32>
    %181 = arith.addf %178, %180 : vector<1x16xf32>
    %182 = math.tanh %181 : vector<1x16xf32>
    %cst_30 = arith.constant 1.000000e+00 : f32
    %183 = vector.broadcast %cst_30 : f32 to vector<1x16xf32>
    %184 = arith.subf %183, %177 : vector<1x16xf32>
    %185 = arith.mulf %184, %182 : vector<1x16xf32>
    %186 = arith.mulf %177, %158 : vector<1x16xf32>
    %187 = arith.addf %185, %186 : vector<1x16xf32>
    %188 = vector.extract_strided_slice %12 {offsets = [6, 0], sizes = [1, 48], strides = [1, 1]} : vector<8x48xf32> to vector<1x48xf32>
    %cst_31 = arith.constant dense<0.000000e+00> : vector<1x48xf32>
    %189 = tpu.matmul %187, %8, %cst_31 {dimension_numbers = #tpu.dot_dimension_numbers<[1], [0], [0], [1], [0, 0, 1, 1], [], []>} : vector<1x16xf32>, vector<16x48xf32>, vector<1x48xf32> -> vector<1x48xf32>
    %190 = arith.addf %189, %9 : vector<1x48xf32>
    %191 = vector.extract_strided_slice %188 {offsets = [0, 0], sizes = [1, 16], strides = [1, 1]} : vector<1x48xf32> to vector<1x16xf32>
    %192 = vector.extract_strided_slice %190 {offsets = [0, 0], sizes = [1, 16], strides = [1, 1]} : vector<1x48xf32> to vector<1x16xf32>
    %193 = arith.addf %191, %192 : vector<1x16xf32>
    %194 = arith.negf %193 : vector<1x16xf32>
    %195 = math.exp %194 : vector<1x16xf32>
    %cst_32 = arith.constant 1.000000e+00 : f32
    %196 = vector.broadcast %cst_32 : f32 to vector<1x16xf32>
    %197 = arith.addf %196, %195 : vector<1x16xf32>
    %198 = arith.divf %196, %197 : vector<1x16xf32>
    %199 = vector.extract_strided_slice %188 {offsets = [0, 16], sizes = [1, 16], strides = [1, 1]} : vector<1x48xf32> to vector<1x16xf32>
    %200 = vector.extract_strided_slice %190 {offsets = [0, 16], sizes = [1, 16], strides = [1, 1]} : vector<1x48xf32> to vector<1x16xf32>
    %201 = arith.addf %199, %200 : vector<1x16xf32>
    %202 = arith.negf %201 : vector<1x16xf32>
    %203 = math.exp %202 : vector<1x16xf32>
    %cst_33 = arith.constant 1.000000e+00 : f32
    %204 = vector.broadcast %cst_33 : f32 to vector<1x16xf32>
    %205 = arith.addf %204, %203 : vector<1x16xf32>
    %206 = arith.divf %204, %205 : vector<1x16xf32>
    %207 = vector.extract_strided_slice %188 {offsets = [0, 32], sizes = [1, 16], strides = [1, 1]} : vector<1x48xf32> to vector<1x16xf32>
    %208 = vector.extract_strided_slice %190 {offsets = [0, 32], sizes = [1, 16], strides = [1, 1]} : vector<1x48xf32> to vector<1x16xf32>
    %209 = arith.mulf %198, %208 : vector<1x16xf32>
    %210 = arith.addf %207, %209 : vector<1x16xf32>
    %211 = math.tanh %210 : vector<1x16xf32>
    %cst_34 = arith.constant 1.000000e+00 : f32
    %212 = vector.broadcast %cst_34 : f32 to vector<1x16xf32>
    %213 = arith.subf %212, %206 : vector<1x16xf32>
    %214 = arith.mulf %213, %211 : vector<1x16xf32>
    %215 = arith.mulf %206, %187 : vector<1x16xf32>
    %216 = arith.addf %214, %215 : vector<1x16xf32>
    %217 = vector.extract_strided_slice %12 {offsets = [7, 0], sizes = [1, 48], strides = [1, 1]} : vector<8x48xf32> to vector<1x48xf32>
    %cst_35 = arith.constant dense<0.000000e+00> : vector<1x48xf32>
    %218 = tpu.matmul %216, %8, %cst_35 {dimension_numbers = #tpu.dot_dimension_numbers<[1], [0], [0], [1], [0, 0, 1, 1], [], []>} : vector<1x16xf32>, vector<16x48xf32>, vector<1x48xf32> -> vector<1x48xf32>
    %219 = arith.addf %218, %9 : vector<1x48xf32>
    %220 = vector.extract_strided_slice %217 {offsets = [0, 0], sizes = [1, 16], strides = [1, 1]} : vector<1x48xf32> to vector<1x16xf32>
    %221 = vector.extract_strided_slice %219 {offsets = [0, 0], sizes = [1, 16], strides = [1, 1]} : vector<1x48xf32> to vector<1x16xf32>
    %222 = arith.addf %220, %221 : vector<1x16xf32>
    %223 = arith.negf %222 : vector<1x16xf32>
    %224 = math.exp %223 : vector<1x16xf32>
    %cst_36 = arith.constant 1.000000e+00 : f32
    %225 = vector.broadcast %cst_36 : f32 to vector<1x16xf32>
    %226 = arith.addf %225, %224 : vector<1x16xf32>
    %227 = arith.divf %225, %226 : vector<1x16xf32>
    %228 = vector.extract_strided_slice %217 {offsets = [0, 16], sizes = [1, 16], strides = [1, 1]} : vector<1x48xf32> to vector<1x16xf32>
    %229 = vector.extract_strided_slice %219 {offsets = [0, 16], sizes = [1, 16], strides = [1, 1]} : vector<1x48xf32> to vector<1x16xf32>
    %230 = arith.addf %228, %229 : vector<1x16xf32>
    %231 = arith.negf %230 : vector<1x16xf32>
    %232 = math.exp %231 : vector<1x16xf32>
    %cst_37 = arith.constant 1.000000e+00 : f32
    %233 = vector.broadcast %cst_37 : f32 to vector<1x16xf32>
    %234 = arith.addf %233, %232 : vector<1x16xf32>
    %235 = arith.divf %233, %234 : vector<1x16xf32>
    %236 = vector.extract_strided_slice %217 {offsets = [0, 32], sizes = [1, 16], strides = [1, 1]} : vector<1x48xf32> to vector<1x16xf32>
    %237 = vector.extract_strided_slice %219 {offsets = [0, 32], sizes = [1, 16], strides = [1, 1]} : vector<1x48xf32> to vector<1x16xf32>
    %238 = arith.mulf %227, %237 : vector<1x16xf32>
    %239 = arith.addf %236, %238 : vector<1x16xf32>
    %240 = math.tanh %239 : vector<1x16xf32>
    %cst_38 = arith.constant 1.000000e+00 : f32
    %241 = vector.broadcast %cst_38 : f32 to vector<1x16xf32>
    %242 = arith.subf %241, %235 : vector<1x16xf32>
    %243 = arith.mulf %242, %240 : vector<1x16xf32>
    %244 = arith.mulf %235, %216 : vector<1x16xf32>
    %245 = arith.addf %243, %244 : vector<1x16xf32>
    %246 = tpu.concatenate %42, %71, %100, %129, %158, %187, %216, %245 in 0 : vector<1x16xf32>, vector<1x16xf32>, vector<1x16xf32>, vector<1x16xf32>, vector<1x16xf32>, vector<1x16xf32>, vector<1x16xf32>, vector<1x16xf32> -> vector<8x16xf32>
    %c0_39 = arith.constant 0 : index
    %c256 = arith.constant 256 : index
    %247 = vector.load %arg0[%c0_39, %c256] : memref<81x1024xf32, #tpu.memory_space<vmem>>, vector<16x10xf32>
    %c16_40 = arith.constant 16 : index
    %c256_41 = arith.constant 256 : index
    %248 = vector.load %arg0[%c16_40, %c256_41] : memref<81x1024xf32, #tpu.memory_space<vmem>>, vector<1x10xf32>
    %cst_42 = arith.constant dense<0.000000e+00> : vector<8x10xf32>
    %249 = tpu.matmul %246, %247, %cst_42 {dimension_numbers = #tpu.dot_dimension_numbers<[1], [0], [0], [1], [0, 0, 1, 1], [], []>} : vector<8x16xf32>, vector<16x10xf32>, vector<8x10xf32> -> vector<8x10xf32>
    %250 = vector.broadcast %248 : vector<1x10xf32> to vector<8x10xf32>
    %251 = arith.addf %249, %250 : vector<8x10xf32>
    %252 = vector.extract_strided_slice %251 {offsets = [0, 0], sizes = [8, 5], strides = [1, 1]} : vector<8x10xf32> to vector<8x5xf32>
    %253 = vector.extract_strided_slice %251 {offsets = [0, 5], sizes = [8, 5], strides = [1, 1]} : vector<8x10xf32> to vector<8x5xf32>
    %cst_43 = arith.constant 5.000000e-01 : f32
    %254 = vector.broadcast %cst_43 : f32 to vector<8x5xf32>
    %255 = arith.mulf %254, %253 : vector<8x5xf32>
    %256 = math.exp %255 : vector<8x5xf32>
    %257 = arith.mulf %4, %256 : vector<8x5xf32>
    %258 = arith.addf %252, %257 : vector<8x5xf32>
    %259 = tpu.concatenate %258, %252 in 1 : vector<8x5xf32>, vector<8x5xf32> -> vector<8x10xf32>
    %cst_44 = arith.constant 0.000000e+00 : f32
    %260 = vector.broadcast %cst_44 : f32 to vector<1x10xf32>
    %261 = vector.extract_strided_slice %259 {offsets = [0, 0], sizes = [7, 10], strides = [1, 1]} : vector<8x10xf32> to vector<7x10xf32>
    %262 = tpu.concatenate %260, %261 in 0 : vector<1x10xf32>, vector<7x10xf32> -> vector<8x10xf32>
    %c0_45 = arith.constant 0 : index
    %c384 = arith.constant 384 : index
    %263 = vector.load %arg0[%c0_45, %c384] : memref<81x1024xf32, #tpu.memory_space<vmem>>, vector<32x40xf32>
    %c32 = arith.constant 32 : index
    %c384_46 = arith.constant 384 : index
    %264 = vector.load %arg0[%c32, %c384_46] : memref<81x1024xf32, #tpu.memory_space<vmem>>, vector<1x40xf32>
    %c0_47 = arith.constant 0 : index
    %c512 = arith.constant 512 : index
    %265 = vector.load %arg0[%c0_47, %c512] : memref<81x1024xf32, #tpu.memory_space<vmem>>, vector<40x40xf32>
    %c40 = arith.constant 40 : index
    %c512_48 = arith.constant 512 : index
    %266 = vector.load %arg0[%c40, %c512_48] : memref<81x1024xf32, #tpu.memory_space<vmem>>, vector<1x40xf32>
    %c0_49 = arith.constant 0 : index
    %c640 = arith.constant 640 : index
    %267 = vector.load %arg0[%c0_49, %c640] : memref<81x1024xf32, #tpu.memory_space<vmem>>, vector<40x16xf32>
    %c40_50 = arith.constant 40 : index
    %c640_51 = arith.constant 640 : index
    %268 = vector.load %arg0[%c40_50, %c640_51] : memref<81x1024xf32, #tpu.memory_space<vmem>>, vector<1x16xf32>
    %cst_52 = arith.constant dense<0.000000e+00> : vector<8x40xf32>
    %269 = tpu.matmul %5, %263, %cst_52 {dimension_numbers = #tpu.dot_dimension_numbers<[1], [0], [0], [1], [0, 0, 1, 1], [], []>} : vector<8x32xf32>, vector<32x40xf32>, vector<8x40xf32> -> vector<8x40xf32>
    %270 = vector.broadcast %264 : vector<1x40xf32> to vector<8x40xf32>
    %271 = arith.addf %269, %270 : vector<8x40xf32>
    %cst_53 = arith.constant 0.000000e+00 : f32
    %272 = vector.broadcast %cst_53 : f32 to vector<8x40xf32>
    %273 = arith.maximumf %271, %272 : vector<8x40xf32>
    %cst_54 = arith.constant dense<0.000000e+00> : vector<8x40xf32>
    %274 = tpu.matmul %273, %265, %cst_54 {dimension_numbers = #tpu.dot_dimension_numbers<[1], [0], [0], [1], [0, 0, 1, 1], [], []>} : vector<8x40xf32>, vector<40x40xf32>, vector<8x40xf32> -> vector<8x40xf32>
    %275 = vector.broadcast %266 : vector<1x40xf32> to vector<8x40xf32>
    %276 = arith.addf %274, %275 : vector<8x40xf32>
    %cst_55 = arith.constant 0.000000e+00 : f32
    %277 = vector.broadcast %cst_55 : f32 to vector<8x40xf32>
    %278 = arith.maximumf %276, %277 : vector<8x40xf32>
    %cst_56 = arith.constant dense<0.000000e+00> : vector<8x16xf32>
    %279 = tpu.matmul %278, %267, %cst_56 {dimension_numbers = #tpu.dot_dimension_numbers<[1], [0], [0], [1], [0, 0, 1, 1], [], []>} : vector<8x40xf32>, vector<40x16xf32>, vector<8x16xf32> -> vector<8x16xf32>
    %280 = vector.broadcast %268 : vector<1x16xf32> to vector<8x16xf32>
    %281 = arith.addf %279, %280 : vector<8x16xf32>
    %c0_57 = arith.constant 0 : index
    %c768 = arith.constant 768 : index
    %282 = vector.load %arg0[%c0_57, %c768] : memref<81x1024xf32, #tpu.memory_space<vmem>>, vector<41x80xf32>
    %c41 = arith.constant 41 : index
    %c768_58 = arith.constant 768 : index
    %283 = vector.load %arg0[%c41, %c768_58] : memref<81x1024xf32, #tpu.memory_space<vmem>>, vector<1x80xf32>
    %c0_59 = arith.constant 0 : index
    %c896 = arith.constant 896 : index
    %284 = vector.load %arg0[%c0_59, %c896] : memref<81x1024xf32, #tpu.memory_space<vmem>>, vector<80x28xf32>
    %c80 = arith.constant 80 : index
    %c896_60 = arith.constant 896 : index
    %285 = vector.load %arg0[%c80, %c896_60] : memref<81x1024xf32, #tpu.memory_space<vmem>>, vector<1x28xf32>
    %286 = tpu.concatenate %262, %258, %3, %281, %2 in 1 : vector<8x10xf32>, vector<8x5xf32>, vector<8x4xf32>, vector<8x16xf32>, vector<8x6xf32> -> vector<8x41xf32>
    %cst_61 = arith.constant dense<0.000000e+00> : vector<8x80xf32>
    %287 = tpu.matmul %286, %282, %cst_61 {dimension_numbers = #tpu.dot_dimension_numbers<[1], [0], [0], [1], [0, 0, 1, 1], [], []>} : vector<8x41xf32>, vector<41x80xf32>, vector<8x80xf32> -> vector<8x80xf32>
    %288 = vector.broadcast %283 : vector<1x80xf32> to vector<8x80xf32>
    %289 = arith.addf %287, %288 : vector<8x80xf32>
    %cst_62 = arith.constant 0.000000e+00 : f32
    %290 = vector.broadcast %cst_62 : f32 to vector<8x80xf32>
    %291 = arith.maximumf %289, %290 : vector<8x80xf32>
    %cst_63 = arith.constant dense<0.000000e+00> : vector<8x28xf32>
    %292 = tpu.matmul %291, %284, %cst_63 {dimension_numbers = #tpu.dot_dimension_numbers<[1], [0], [0], [1], [0, 0, 1, 1], [], []>} : vector<8x80xf32>, vector<80x28xf32>, vector<8x28xf32> -> vector<8x28xf32>
    %293 = vector.broadcast %285 : vector<1x28xf32> to vector<8x28xf32>
    %294 = arith.addf %292, %293 : vector<8x28xf32>
    %295 = tpu.concatenate %251, %294, %246 in 1 : vector<8x10xf32>, vector<8x28xf32>, vector<8x16xf32> -> vector<8x54xf32>
    %c0_64 = arith.constant 0 : index
    %c0_65 = arith.constant 0 : index
    %296 = vector.load %arg2[%c0_64, %c0_65] : memref<8x54xf32, #tpu.memory_space<vmem>>, vector<8x54xf32>
    tpu.vector_store %arg2[%c0_64, %c0_65], %295 {strides = array<i32>} : memref<8x54xf32, #tpu.memory_space<vmem>>, vector<8x54xf32>,
    return
  }
}

</mosaic_0001>

<bundles_post_ra>
// kernel: forward.1
= control target key start
LH: loop header
LB: loop body
LE: loop exit
PB: predicated region body
PF: predicated region fallthrough
CT: control target
= control target key end

     0   :  { %7 = vsyncpa [#allocation3], 0  ;;  %s1836_s9 = smov [#allocation2]   ;;  %s2079_s0 = inlined_call_operand.hbm [shape: f32[81,1024], index: 0, kind: input, shape index: {}]   ;;  %s2080_s1 = inlined_call_operand.vmem [shape: f32[8,47], index: 1, kind: input, shape index: {}]   ;;  %s2081_s2 = inlined_call_operand.vmem [shape: f32[8,54], index: 2, kind: output, shape index: {}]  }
   0x1   :  { %s13_s10 = sshll.u32 %s1836_s9, 4  ;;  %s14_s10 = int_to_ptr.vmem [resolvable:$true] %s13_s10 }
   0x2   :  { %s1822_s11 = scalar_lea.vmem %s14_s10, 11264  ;;  %p1827_p1 = scmp.lt.s32.totalorder %s14_s10, %s14_s10 }
   0x3   :  { %p1823_p0 = scmp.ne.s32.totalorder %s14_s10, %s1822_s11  ;;  %p1828_p2 = scmp.lt.s32.totalorder %s1822_s11, %s1822_s11 }
   0x5   :  { %p1829_p3 = por %p1828_p2, %p1827_p1 }
   0x7   :  { %p1830_p4 = pnand %p1829_p3, %p1823_p0 }
   0x9   :  { %1833 = shalt.err (!%p1830_p4)
}
   0xa   :  { %s1837_s12 = smov 1024   ;;  %s1838_s13 = smov 64  }
   0xb   :  { %19 = dma.hbm_to_vmem [thread:$0]  %s2079_s0, 11264, %s14_s10, [#allocation3], %s1837_s12, %s1837_s12, %s1838_s13  }
   0xc   :  { %1834 = dma.done.wait [#allocation3], 11264  }
   0xd   :  { %1835 = vsyncadd [#allocation3], 4294956032  ;;  %v1839_v0 = vmov 0.0   ;;  %vm1840_vm0 = vmmov 0   ;;  %vm36_vm1 = vcmask 1041408   ;;  %v1876_v2 = vld [vmem:[#allocation2 + $0x48] sm:$0xff] }
   0xe   :  { %1603 = vmatprep.subr.mxu0 %v1839_v0  ;;  %1610 = vmatprep.subr.mxu1 %v1839_v0  ;;  %v27_v1 = vld [vmem:[#allocation2 + $0x40] sm:$0x3]  ;;  %v1880_v4 = vld [vmem:[#allocation2 + $0x8] sm:$0xff]  ;;  %vm32_vm2 = vcmask 80896   ;;  %v28_v12 = vld [vmem:[#allocation2 + $0x42] ss:$0 sm:$0xff] }
   0xf   :  { %1607 = vmatprep.mubr.msk.f32.mxu0 %vm1840_vm0, %v1839_v0  ;;  %1614 = vmatprep.mubr.msk.f32.mxu1 %vm1840_vm0, %v1839_v0  ;;  %v26_v3 = vld [vmem:[#allocation2] sm:$0xff]  ;;  %v1907_v6 = vld [vmem:[#allocation2 + $0x88] ss:$0 sm:$0xff]  ;;  %s1842_s17 = smov 32   ;;  %s1843_s18 = smov 112   ;;  %vm110_vm3 = vcmask 130048  }
  0x10   :  { %1604 = vmatpush3.msk.msra.mxu0 %vm36_vm1, %v27_v1  ;;  %1611 = vmatpush3.msra.mxu1 %v1876_v2  ;;  %v1885_v5 = vld [vmem:[%s2080_s1] sm:$0xff]  ;;  %s1841_s1 = smov 96   ;;  %vm951_vm4 = vcmask 1040384   ;;  %vm954_vm5 = vcmask 1042432   ;;  %vm956_vm6 = vcmask 1043456   ;;  %vm958_vm7 = vcmask 1044480  }
  0x11   :  { %1605 = vmatprep.subr.mxu0 %v1839_v0  ;;  %1612 = vmatprep.subr.mxu1 %v1839_v0  ;;  %vm960_vm8 = vcmask 1045504   ;;  %s1844_s19 = smov 113   ;;  %vm962_vm9 = vcmask 1046528   ;;  %vm1084_vm10 = vcmask 261120   ;;  %vm1158_vm11 = vcmask 326656   ;;  %s1845_s20 = smov 5  }
  0x12   :  { %1606 = vmatpush3.msra.mxu0 %v26_v3  ;;  %1613 = vmatpush3.msra.mxu1 %v1880_v4  ;;  %s1846_s21 = smov 9   ;;  %s1847_s22 = smov 35   ;;  %vm1059_vm12 = vcmask 39936   ;;  %vm1339_vm13 = vcmask 121856   ;;  %vm1341_vm14 = vcmask 154624   ;;  %vm1343_vm15 = vcmask 285696  }
  0x13   :  { %1608 = vmatmul.mubr.msk.f32.vlgmr.msra.gmra.mxu0 %vm32_vm2, %v1885_v5  ;;  %1615 = vmatmul.mubr.f32.vlgmr.msra.gmra.mxu1 %v1839_v0  ;;  %s1848_s23 = smov 22   ;;  %s1849_s24 = smov 118  }
  0x14   :  { %1617 = vmatprep.subr.mxu0 %v1839_v0  ;;  %1621 = vmatprep.mubr.msk.f32.mxu0 %vm1840_vm0, %v1839_v0  ;;  %s1850_s25 = smov 10   ;;  %s1851_s26 = smov 19  }
  0x15   :  { %1618 = vmatpush3.msra.mxu0 %v1876_v2  ;;  %1624 = vmatprep.subr.mxu1 %v1839_v0 }
  0x16   :  { %1619 = vmatprep.subr.mxu0 %v1839_v0  ;;  %1625 = vmatpush3.msra.mxu1 %v1876_v2 }
  0x17   :  { %1620 = vmatpush3.msra.mxu0 %v1880_v4  ;;  %1626 = vmatprep.subr.mxu1 %v1839_v0 }
  0x18   :  { %1627 = vmatpush3.msra.mxu1 %v1880_v4  ;;  %1628 = vmatprep.mubr.msk.f32.mxu1 %vm1840_vm0, %v1839_v0 }
  0x19   :  { %1631 = vmatprep.subr.mxu0 %v1839_v0  ;;  %1638 = vmatprep.subr.mxu1 %v1839_v0 }
  0xd3   :  { %v106_v7 = vpop.f32.mrf.mxu0  ;;  %v180_v8 = vpop.f32.mrf.mxu1 }
  0xd4   :  { %v181_v9 = vadd.f32 %v180_v8, %v1907_v6  ;;  %v1911_v13 = vadd.f32 %v106_v7, %v28_v12 }
  0xd5   :  { %v1616_v10 = vpop.f32.mrf.mxu1  ;;  %v1609_v11 = vpop.f32.mrf.mxu0 }
  0xd6   :  { %192 = vrot.lane.b32.xlu0 %v181_v9, %s1841_s1  ;;  %v184_v14 = vadd.f32 %v181_v9, %v1911_v13 }
  0xd8   :  { %v1516_v15 = vmul.f32 -1.442695, %v184_v14 }
  0xda   :  { %1764 = vpow2.f32 %v1516_v15 }
  0xe7   :  { %v1765_v16 = vpop.eup %1764 }
  0xe8   :  { %v188_v17 = vadd.f32 1.0, %v1765_v16 }
  0xea   :  { %1766 = vrcp.f32 %v188_v17 }
  0xf7   :  { %v1767_v18 = vpop.eup %1766 }
  0xf8   :  { %v202_v24 = vsub.f32 1.0, %v1767_v18  ;;  %v208_v26 = vmul.f32 0.0, %v1767_v18 }
 0x148   :  { %v193_v19 = vpop.permute.xlu0 %192 }
 0x149   :  { %v195_v20 = vmul.f32 %v1767_v18, %v193_v19 }
 0x14b   :  { %197 = vrot.lane.b32.xlu0 %v195_v20, %s1842_s17 }
 0x1bd   :  { %v198_v21 = vpop.permute.xlu0 %197 }
 0x1be   :  { %v200_v22 = vadd.f32 %v198_v21, %v1911_v13 }
 0x1c0   :  { %1768 = vtanh.f32 %v200_v22 }
 0x1cd   :  { %v1769_v23 = vpop.eup %1768 }
 0x1ce   :  { %204 = vrot.lane.b32.xlu1 %v1769_v23, %s1843_s18 }
 0x240   :  { %v205_v25 = vpop.permute.xlu1 %204 }
 0x241   :  { %v207_v27 = vmul.f32 %v205_v25, %v202_v24 }
 0x243   :  { %v1917_v28 = vadd.f32 %v208_v26, %v207_v27 }
 0x245   :  { %211 = vrot.lane.b32.xlu1 %v1917_v28, %s1843_s18  ;;  %v311_v45 = vrot.slane %v1917_v28, 7 }
 0x2b7   :  { %v212_v29 = vpop.permute.xlu1 %211 }
 0x2b8   :  { %1622 = vmatmul.mubr.msk.f32.vlgmr.msra.gmra.mxu0 %vm110_vm3, %v212_v29 }
 0x2b9   :  { %1632 = vmatpush3.msra.mxu0 %v1876_v2  ;;  %1635 = vmatprep.mubr.msk.f32.mxu0 %vm1840_vm0, %v1839_v0 }
 0x2ba   :  { %1633 = vmatprep.subr.mxu0 %v1839_v0 }
 0x2bb   :  { %1634 = vmatpush3.msra.mxu0 %v1880_v4 }
 0x2bc   :  { %1645 = vmatprep.subr.mxu0 %v1839_v0 }
 0x378   :  { %v281_v30 = vpop.f32.mrf.mxu0 }
 0x379   :  { %v282_v31 = vadd.f32 %v281_v30, %v1907_v6 }
 0x37a   :  { %v1623_v32 = vpop.f32.mrf.mxu0 }
 0x37b   :  { %v286_v33 = vrot.slane %v282_v31, 7 }
 0x37d   :  { %295 = vrot.lane.b32.xlu0 %v286_v33, %s1841_s1  ;;  %v288_v34 = vadd.f32 %v286_v33, %v1911_v13 }
 0x37f   :  { %v1518_v35 = vmul.f32 -1.442695, %v288_v34 }
 0x381   :  { %1770 = vpow2.f32 %v1518_v35 }
 0x38e   :  { %v1771_v36 = vpop.eup %1770 }
 0x38f   :  { %v292_v37 = vadd.f32 1.0, %v1771_v36 }
 0x391   :  { %1772 = vrcp.f32 %v292_v37 }
 0x39e   :  { %v1773_v38 = vpop.eup %1772 }
 0x39f   :  { %v305_v44 = vsub.f32 1.0, %v1773_v38  ;;  %v313_v47 = vmul.f32 %v1773_v38, %v311_v45 }
 0x3ef   :  { %v296_v39 = vpop.permute.xlu0 %295 }
 0x3f0   :  { %v298_v40 = vmul.f32 %v1773_v38, %v296_v39 }
 0x3f2   :  { %300 = vrot.lane.b32.xlu1 %v298_v40, %s1842_s17 }
 0x464   :  { %v301_v41 = vpop.permute.xlu1 %300 }
 0x465   :  { %v303_v42 = vadd.f32 %v301_v41, %v1911_v13 }
 0x467   :  { %1774 = vtanh.f32 %v303_v42 }
 0x474   :  { %v1775_v43 = vpop.eup %1774 }
 0x475   :  { %307 = vrot.lane.b32.xlu0 %v1775_v43, %s1843_s18 }
 0x4e7   :  { %v308_v46 = vpop.permute.xlu0 %307 }
 0x4e8   :  { %v310_v48 = vmul.f32 %v308_v46, %v305_v44 }
 0x4ea   :  { %v314_v49 = vadd.f32 %v313_v47, %v310_v48 }
 0x4ec   :  { %v316_v50 = vrot.slane %v314_v49, 1  ;;  %v417_v8 = vrot.slane %v314_v49, 7  ;;  %v952_v14 = vsel %vm951_vm4, %v1917_v28, %v314_v49 }
 0x4ee   :  { %317 = vrot.lane.b32.xlu1 %v316_v50, %s1843_s18 }
 0x560   :  { %v318_v51 = vpop.permute.xlu1 %317 }
 0x561   :  { %1629 = vmatmul.mubr.msk.f32.vlgmr.msra.gmra.mxu1 %vm110_vm3, %v318_v51 }
 0x562   :  { %1639 = vmatpush3.msra.mxu1 %v1876_v2  ;;  %1642 = vmatprep.mubr.msk.f32.mxu1 %vm1840_vm0, %v1839_v0 }
 0x563   :  { %1640 = vmatprep.subr.mxu1 %v1839_v0 }
 0x564   :  { %1641 = vmatpush3.msra.mxu1 %v1880_v4 }
 0x565   :  { %1652 = vmatprep.subr.mxu1 %v1839_v0 }
 0x621   :  { %v387_v52 = vpop.f32.mrf.mxu1 }
 0x622   :  { %v388_v53 = vadd.f32 %v387_v52, %v1907_v6 }
 0x623   :  { %v1630_v54 = vpop.f32.mrf.mxu1 }
 0x624   :  { %v392_v55 = vrot.slane %v388_v53, 6 }
 0x626   :  { %401 = vrot.lane.b32.xlu0 %v392_v55, %s1841_s1  ;;  %v394_v56 = vadd.f32 %v392_v55, %v1911_v13 }
 0x628   :  { %v1520_v57 = vmul.f32 -1.442695, %v394_v56 }
 0x62a   :  { %1776 = vpow2.f32 %v1520_v57 }
 0x637   :  { %v1777_v58 = vpop.eup %1776 }
 0x638   :  { %v398_v59 = vadd.f32 1.0, %v1777_v58 }
 0x63a   :  { %1778 = vrcp.f32 %v398_v59 }
 0x647   :  { %v1779_v60 = vpop.eup %1778 }
 0x648   :  { %v411_v7 = vsub.f32 1.0, %v1779_v60  ;;  %v419_v10 = vmul.f32 %v1779_v60, %v417_v8 }
 0x698   :  { %v402_v61 = vpop.permute.xlu0 %401 }
 0x699   :  { %v404_v62 = vmul.f32 %v1779_v60, %v402_v61 }
 0x69b   :  { %406 = vrot.lane.b32.xlu1 %v404_v62, %s1842_s17 }
 0x70d   :  { %v407_v63 = vpop.permute.xlu1 %406 }
 0x70e   :  { %v409_v1 = vadd.f32 %v407_v63, %v1911_v13 }
 0x710   :  { %1780 = vtanh.f32 %v409_v1 }
 0x71d   :  { %v1781_v3 = vpop.eup %1780 }
 0x71e   :  { %413 = vrot.lane.b32.xlu0 %v1781_v3, %s1843_s18 }
 0x790   :  { %v414_v9 = vpop.permute.xlu0 %413 }
 0x791   :  { %v416_v11 = vmul.f32 %v414_v9, %v411_v7 }
 0x793   :  { %v420_v12 = vadd.f32 %v419_v10, %v416_v11 }
 0x795   :  { %v953_v15 = vsel %vm36_vm1, %v952_v14, %v420_v12  ;;  %v422_v16 = vrot.slane %v420_v12, 2  ;;  %v523_v33 = vrot.slane %v420_v12, 7  ;;  %vm1423_vm1 = vcmask 654336  }
 0x797   :  { %423 = vrot.lane.b32.xlu1 %v422_v16, %s1843_s18 }
 0x809   :  { %v424_v17 = vpop.permute.xlu1 %423 }
 0x80a   :  { %1636 = vmatmul.mubr.msk.f32.vlgmr.msra.gmra.mxu0 %vm110_vm3, %v424_v17 }
 0x80b   :  { %1646 = vmatpush3.msra.mxu0 %v1876_v2  ;;  %1649 = vmatprep.mubr.msk.f32.mxu0 %vm1840_vm0, %v1839_v0 }
 0x80c   :  { %1647 = vmatprep.subr.mxu0 %v1839_v0 }
 0x80d   :  { %1648 = vmatpush3.msra.mxu0 %v1880_v4 }
 0x80e   :  { %1659 = vmatprep.subr.mxu0 %v1839_v0 }
 0x8ca   :  { %v493_v18 = vpop.f32.mrf.mxu0 }
 0x8cb   :  { %v494_v19 = vadd.f32 %v493_v18, %v1907_v6 }
 0x8cc   :  { %v1637_v20 = vpop.f32.mrf.mxu0 }
 0x8cd   :  { %v498_v21 = vrot.slane %v494_v19, 5 }
 0x8cf   :  { %507 = vrot.lane.b32.xlu0 %v498_v21, %s1841_s1  ;;  %v500_v22 = vadd.f32 %v498_v21, %v1911_v13 }
 0x8d1   :  { %v1522_v23 = vmul.f32 -1.442695, %v500_v22 }
 0x8d3   :  { %1782 = vpow2.f32 %v1522_v23 }
 0x8e0   :  { %v1783_v24 = vpop.eup %1782 }
 0x8e1   :  { %v504_v25 = vadd.f32 1.0, %v1783_v24 }
 0x8e3   :  { %1784 = vrcp.f32 %v504_v25 }
 0x8f0   :  { %v1785_v26 = vpop.eup %1784 }
 0x8f1   :  { %v517_v32 = vsub.f32 1.0, %v1785_v26  ;;  %v525_v35 = vmul.f32 %v1785_v26, %v523_v33 }
 0x941   :  { %v508_v27 = vpop.permute.xlu0 %507 }
 0x942   :  { %v510_v28 = vmul.f32 %v1785_v26, %v508_v27 }
 0x944   :  { %512 = vrot.lane.b32.xlu1 %v510_v28, %s1842_s17 }
 0x9b6   :  { %v513_v29 = vpop.permute.xlu1 %512 }
 0x9b7   :  { %v515_v30 = vadd.f32 %v513_v29, %v1911_v13 }
 0x9b9   :  { %1786 = vtanh.f32 %v515_v30 }
 0x9c6   :  { %v1787_v31 = vpop.eup %1786 }
 0x9c7   :  { %519 = vrot.lane.b32.xlu0 %v1787_v31, %s1843_s18 }
 0xa39   :  { %v520_v34 = vpop.permute.xlu0 %519 }
 0xa3a   :  { %v522_v36 = vmul.f32 %v520_v34, %v517_v32 }
 0xa3c   :  { %v526_v37 = vadd.f32 %v525_v35, %v522_v36 }
 0xa3e   :  { %v955_v38 = vsel %vm954_vm5, %v953_v15, %v526_v37  ;;  %v528_v39 = vrot.slane %v526_v37, 3  ;;  %v629_v56 = vrot.slane %v526_v37, 7 }
 0xa40   :  { %529 = vrot.lane.b32.xlu1 %v528_v39, %s1843_s18 }
 0xab2   :  { %v530_v40 = vpop.permute.xlu1 %529 }
 0xab3   :  { %1643 = vmatmul.mubr.msk.f32.vlgmr.msra.gmra.mxu1 %vm110_vm3, %v530_v40 }
 0xab4   :  { %1653 = vmatpush3.msra.mxu1 %v1876_v2  ;;  %1656 = vmatprep.mubr.msk.f32.mxu1 %vm1840_vm0, %v1839_v0 }
 0xab5   :  { %1654 = vmatprep.subr.mxu1 %v1839_v0 }
 0xab6   :  { %1655 = vmatpush3.msra.mxu1 %v1880_v4 }
 0xab7   :  { %1666 = vmatprep.subr.mxu1 %v1839_v0 }
 0xb73   :  { %v599_v41 = vpop.f32.mrf.mxu1 }
 0xb74   :  { %v600_v42 = vadd.f32 %v599_v41, %v1907_v6 }
 0xb75   :  { %v1644_v43 = vpop.f32.mrf.mxu1 }
 0xb76   :  { %v604_v44 = vrot.slane %v600_v42, 4 }
 0xb78   :  { %613 = vrot.lane.b32.xlu0 %v604_v44, %s1841_s1  ;;  %v606_v45 = vadd.f32 %v604_v44, %v1911_v13 }
 0xb7a   :  { %v1524_v46 = vmul.f32 -1.442695, %v606_v45 }
 0xb7c   :  { %1788 = vpow2.f32 %v1524_v46 }
 0xb89   :  { %v1789_v47 = vpop.eup %1788 }
 0xb8a   :  { %v610_v48 = vadd.f32 1.0, %v1789_v47 }
 0xb8c   :  { %1790 = vrcp.f32 %v610_v48 }
 0xb99   :  { %v1791_v49 = vpop.eup %1790 }
 0xb9a   :  { %v623_v55 = vsub.f32 1.0, %v1791_v49  ;;  %v631_v58 = vmul.f32 %v1791_v49, %v629_v56 }
 0xbea   :  { %v614_v50 = vpop.permute.xlu0 %613 }
 0xbeb   :  { %v616_v51 = vmul.f32 %v1791_v49, %v614_v50 }
 0xbed   :  { %618 = vrot.lane.b32.xlu1 %v616_v51, %s1842_s17 }
 0xc5f   :  { %v619_v52 = vpop.permute.xlu1 %618 }
 0xc60   :  { %v621_v53 = vadd.f32 %v619_v52, %v1911_v13 }
 0xc62   :  { %1792 = vtanh.f32 %v621_v53 }
 0xc6f   :  { %v1793_v54 = vpop.eup %1792 }
 0xc70   :  { %625 = vrot.lane.b32.xlu0 %v1793_v54, %s1843_s18 }
 0xce2   :  { %v626_v57 = vpop.permute.xlu0 %625 }
 0xce3   :  { %v628_v59 = vmul.f32 %v626_v57, %v623_v55 }
 0xce5   :  { %v632_v60 = vadd.f32 %v631_v58, %v628_v59 }
 0xce7   :  { %v957_v61 = vsel %vm956_vm6, %v955_v38, %v632_v60  ;;  %v634_v62 = vrot.slane %v632_v60, 4  ;;  %v735_v19 = vrot.slane %v632_v60, 7 }
 0xce9   :  { %635 = vrot.lane.b32.xlu1 %v634_v62, %s1843_s18 }
 0xd5b   :  { %v636_v63 = vpop.permute.xlu1 %635 }
 0xd5c   :  { %1650 = vmatmul.mubr.msk.f32.vlgmr.msra.gmra.mxu0 %vm110_vm3, %v636_v63  ;;  %v964_v63 = vld [vmem:[#allocation2 + $0x10] sm:$0xff] }
 0xd5d   :  { %1660 = vmatpush3.msra.mxu0 %v1876_v2  ;;  %1663 = vmatprep.mubr.msk.f32.mxu0 %vm1840_vm0, %v1839_v0 }
 0xd5e   :  { %1661 = vmatprep.subr.mxu0 %v1839_v0 }
 0xd5f   :  { %1662 = vmatpush3.msra.mxu0 %v1880_v4 }
 0xd60   :  { %1697 = vmatprep.subr.mxu0 %v1839_v0 }
 0xe1c   :  { %v705_v1 = vpop.f32.mrf.mxu0 }
 0xe1d   :  { %v706_v3 = vadd.f32 %v705_v1, %v1907_v6 }
 0xe1e   :  { %v1651_v7 = vpop.f32.mrf.mxu0 }
 0xe1f   :  { %v710_v8 = vrot.slane %v706_v3, 3 }
 0xe21   :  { %719 = vrot.lane.b32.xlu0 %v710_v8, %s1841_s1  ;;  %v712_v9 = vadd.f32 %v710_v8, %v1911_v13 }
 0xe23   :  { %v1526_v10 = vmul.f32 -1.442695, %v712_v9 }
 0xe25   :  { %1794 = vpow2.f32 %v1526_v10 }
 0xe32   :  { %v1795_v2 = vpop.eup %1794 }
 0xe33   :  { %v716_v11 = vadd.f32 1.0, %v1795_v2 }
 0xe35   :  { %1796 = vrcp.f32 %v716_v11  ;;  %v1068_v11 = vld [vmem:[#allocation2 + $0xd8] sm:$0xff] }
 0xe42   :  { %v1797_v12 = vpop.eup %1796 }
 0xe43   :  { %v729_v18 = vsub.f32 1.0, %v1797_v12  ;;  %v737_v21 = vmul.f32 %v1797_v12, %v735_v19  ;;  %v1072_v19 = vld [vmem:[#allocation2 + $0xa0] sm:$0xff] }
 0xe93   :  { %v720_v14 = vpop.permute.xlu0 %719 }
 0xe94   :  { %v722_v15 = vmul.f32 %v1797_v12, %v720_v14  ;;  %v1067_v14 = vld [vmem:[#allocation2 + $0x98] sm:$0xff] }
 0xe96   :  { %724 = vrot.lane.b32.xlu1 %v722_v15, %s1842_s17  ;;  %v1066_v15 = vld [vmem:[#allocation2 + $0x58] sm:$0xff] }
 0xf08   :  { %v725_v4 = vpop.permute.xlu1 %724 }
 0xf09   :  { %v727_v16 = vadd.f32 %v725_v4, %v1911_v13  ;;  %v1065_v4 = vld [vmem:[#allocation2 + $0x18] sm:$0xff] }
 0xf0b   :  { %1798 = vtanh.f32 %v727_v16 }
 0xf18   :  { %v1799_v17 = vpop.eup %1798 }
 0xf19   :  { %731 = vrot.lane.b32.xlu0 %v1799_v17, %s1843_s18  ;;  %v1074_v17 = vld [vmem:[#allocation2 + $0x120] sm:$0xff] }
 0xf8b   :  { %v732_v20 = vpop.permute.xlu0 %731 }
 0xf8c   :  { %v734_v22 = vmul.f32 %v732_v20, %v729_v18  ;;  %v1073_v18 = vld [vmem:[#allocation2 + $0xe0] sm:$0xff] }
 0xf8d   :  { %v1071_v20 = vld [vmem:[#allocation2 + $0x60] sm:$0xff] }
 0xf8e   :  { %v738_v23 = vadd.f32 %v737_v21, %v734_v22  ;;  %v1070_v21 = vld [vmem:[#allocation2 + $0x20] sm:$0xff]  ;;  %v966_v22 = vld [vmem:[#allocation2 + $0x90] ss:$0 sm:$0xff] }
 0xf90   :  { %v740_v24 = vrot.slane %v738_v23, 5  ;;  %v959_v25 = vsel %vm958_vm7, %v957_v61, %v738_v23  ;;  %v841_v42 = vrot.slane %v738_v23, 7 }
 0xf92   :  { %741 = vrot.lane.b32.xlu1 %v740_v24, %s1843_s18 }
0x1004   :  { %v742_v26 = vpop.permute.xlu1 %741 }
0x1005   :  { %1657 = vmatmul.mubr.msk.f32.vlgmr.msra.gmra.mxu1 %vm110_vm3, %v742_v26 }
0x1006   :  { %1670 = vmatprep.mubr.msk.f32.mxu1 %vm1840_vm0, %v1839_v0 }
0x10c5   :  { %v811_v27 = vpop.f32.mrf.mxu1 }
0x10c6   :  { %v812_v28 = vadd.f32 %v811_v27, %v1907_v6 }
0x10c7   :  { %v1658_v29 = vpop.f32.mrf.mxu1 }
0x10c8   :  { %v816_v30 = vrot.slane %v812_v28, 2  ;;  %v1069_v28 = vld [vmem:[#allocation2 + $0x118] ss:$0 sm:$0xff] }
0x10ca   :  { %825 = vrot.lane.b32.xlu0 %v816_v30, %s1841_s1  ;;  %v818_v31 = vadd.f32 %v816_v30, %v1911_v13 }
0x10cc   :  { %v1528_v32 = vmul.f32 -1.442695, %v818_v31 }
0x10ce   :  { %1800 = vpow2.f32 %v1528_v32 }
0x10db   :  { %v1801_v33 = vpop.eup %1800 }
0x10dc   :  { %v822_v34 = vadd.f32 1.0, %v1801_v33 }
0x10de   :  { %1802 = vrcp.f32 %v822_v34  ;;  %v1080_v34 = vld [vmem:[#allocation2 + $0x128] sm:$0xff] }
0x10eb   :  { %v1803_v35 = vpop.eup %1802 }
0x10ec   :  { %v835_v41 = vsub.f32 1.0, %v1803_v35  ;;  %v843_v44 = vmul.f32 %v1803_v35, %v841_v42 }
0x113c   :  { %v826_v36 = vpop.permute.xlu0 %825 }
0x113d   :  { %v828_v37 = vmul.f32 %v1803_v35, %v826_v36  ;;  %v1079_v35 = vld [vmem:[#allocation2 + $0xe8] sm:$0xff] }
0x113e   :  { %v1078_v36 = vld [vmem:[#allocation2 + $0xa8] sm:$0xff] }
0x113f   :  { %830 = vrot.lane.b32.xlu1 %v828_v37, %s1842_s17  ;;  %v1077_v37 = vld [vmem:[#allocation2 + $0x68] sm:$0xff] }
0x11b1   :  { %v831_v38 = vpop.permute.xlu1 %830 }
0x11b2   :  { %v833_v39 = vadd.f32 %v831_v38, %v1911_v13  ;;  %v1076_v38 = vld [vmem:[#allocation2 + $0x28] sm:$0xff] }
0x11b4   :  { %1804 = vtanh.f32 %v833_v39 }
0x11c1   :  { %v1805_v40 = vpop.eup %1804 }
0x11c2   :  { %837 = vrot.lane.b32.xlu0 %v1805_v40, %s1843_s18 }
0x1234   :  { %v838_v43 = vpop.permute.xlu0 %837 }
0x1235   :  { %v840_v45 = vmul.f32 %v838_v43, %v835_v41  ;;  %v1075_v41 = vld [vmem:[#allocation2 + $0x160] ss:$0 sm:$0xff] }
0x1237   :  { %v844_v46 = vadd.f32 %v843_v44, %v840_v45 }
0x1239   :  { %v846_v47 = vrot.slane %v844_v46, 6  ;;  %v961_v48 = vsel %vm960_vm8, %v959_v25, %v844_v46  ;;  %v947_v7 = vrot.slane %v844_v46, 7 }
0x123b   :  { %847 = vrot.lane.b32.xlu1 %v846_v47, %s1843_s18 }
0x12ad   :  { %v848_v49 = vpop.permute.xlu1 %847 }
0x12ae   :  { %1664 = vmatmul.mubr.msk.f32.vlgmr.msra.gmra.mxu0 %vm110_vm3, %v848_v49  ;;  %v1309_v49 = vld [vmem:[#allocation2 + $0xf0] sm:$0xff] }
0x12af   :  { %1707 = vmatprep.mubr.msk.f32.mxu0 %vm1840_vm0, %v1839_v0  ;;  %1698 = vmatpush3.msra.mxu0 %v1080_v34 }
0x12b0   :  { %1699 = vmatprep.subr.mxu0 %v1839_v0 }
0x12b1   :  { %1700 = vmatpush3.msra.mxu0 %v1079_v35 }
0x12b2   :  { %1701 = vmatprep.subr.mxu0 %v1839_v0 }
0x12b3   :  { %1702 = vmatpush3.msra.mxu0 %v1078_v36 }
0x12b4   :  { %1703 = vmatprep.subr.mxu0 %v1839_v0 }
0x12b5   :  { %1704 = vmatpush3.msra.mxu0 %v1077_v37 }
0x12b6   :  { %1705 = vmatprep.subr.mxu0 %v1839_v0 }
0x12b7   :  { %1706 = vmatpush3.msra.mxu0 %v1076_v38 }
0x12b8   :  { %1725 = vmatprep.subr.mxu0 %v1839_v0 }
0x136e   :  { %v917_v50 = vpop.f32.mrf.mxu0 }
0x136f   :  { %v918_v51 = vadd.f32 %v917_v50, %v1907_v6  ;;  %v965_v6 = vld [vmem:[#allocation2 + $0x50] sm:$0xff] }
0x1370   :  { %v1665_v52 = vpop.f32.mrf.mxu0  ;;  %1667 = vmatpush3.msra.mxu1 %v965_v6  ;;  %v1308_v50 = vld [vmem:[#allocation2 + $0xb0] sm:$0xff]  ;;  %v1316_v6 = vld [vmem:[#allocation2 + $0xf8] sm:$0xff] }
0x1371   :  { %v922_v53 = vrot.slane %v918_v51, 1  ;;  %1668 = vmatprep.subr.mxu1 %v1839_v0  ;;  %v1307_v51 = vld [vmem:[#allocation2 + $0x70] sm:$0xff] }
0x1372   :  { %1669 = vmatpush3.msra.mxu1 %v964_v63  ;;  %v1306_v52 = vld [vmem:[#allocation2 + $0x30] sm:$0xff] }
0x1373   :  { %931 = vrot.lane.b32.xlu0 %v922_v53, %s1841_s1  ;;  %v924_v54 = vadd.f32 %v922_v53, %v1911_v13  ;;  %1673 = vmatprep.subr.mxu1 %v1839_v0  ;;  %v1322_v53 = vld [vmem:[#allocation2 + $0x278] sm:$0xff] }
0x1375   :  { %v1530_v55 = vmul.f32 -1.442695, %v924_v54  ;;  %v1321_v54 = vld [vmem:[#allocation2 + $0x238] sm:$0xff] }
0x1377   :  { %1806 = vpow2.f32 %v1530_v55  ;;  %v1320_v55 = vld [vmem:[#allocation2 + $0x1f8] sm:$0xff] }
0x1384   :  { %v1807_v56 = vpop.eup %1806 }
0x1385   :  { %v928_v57 = vadd.f32 1.0, %v1807_v56  ;;  %v1319_v56 = vld [vmem:[#allocation2 + $0x1b8] sm:$0xff] }
0x1387   :  { %1808 = vrcp.f32 %v928_v57  ;;  %v1081_v57 = vld [vmem:[#allocation2 + $0x168] ss:$0 sm:$0xff] }
0x1394   :  { %v1809_v58 = vpop.eup %1808 }
0x1395   :  { %v941_v3 = vsub.f32 1.0, %v1809_v58  ;;  %v949_v9 = vmul.f32 %v1809_v58, %v947_v7 }
0x13e5   :  { %v932_v59 = vpop.permute.xlu0 %931 }
0x13e6   :  { %v934_v60 = vmul.f32 %v1809_v58, %v932_v59  ;;  %v1318_v58 = vld [vmem:[#allocation2 + $0x178] sm:$0xff] }
0x13e8   :  { %936 = vrot.lane.b32.xlu1 %v934_v60, %s1842_s17  ;;  %v1317_v60 = vld [vmem:[#allocation2 + $0x138] sm:$0xff] }
0x145a   :  { %v937_v61 = vpop.permute.xlu1 %936 }
0x145b   :  { %v939_v62 = vadd.f32 %v937_v61, %v1911_v13 }
0x145d   :  { %1810 = vtanh.f32 %v939_v62 }
0x146a   :  { %v1811_v1 = vpop.eup %1810 }
0x146b   :  { %943 = vrot.lane.b32.xlu0 %v1811_v1, %s1843_s18 }
0x146f   :  { %1082 = vrot.lane.b32.xlu0 %v1885_v5, %s1844_s19 }
0x14dd   :  { %v944_v8 = vpop.permute.xlu0 %943 }
0x14de   :  { %v946_v13 = vmul.f32 %v944_v8, %v941_v3 }
0x14e0   :  { %v950_v10 = vadd.f32 %v949_v9, %v946_v13 }
0x14e1   :  { %v1083_v16 = vpop.permute.xlu0 %1082 }
0x14e2   :  { %v2017_v2 = vsel %vm962_vm9, %v961_v48, %v950_v10  ;;  %v1311_v48 = vld [vmem:[#allocation2 + $0x170] sm:$0x1] }
0x14e3   :  { %968 = vrot.lane.b32.xlu1 %v2017_v2, %s1843_s18 }
0x1555   :  { %v969_v12 = vpop.permute.xlu1 %968 }
0x1556   :  { %1671 = vmatmul.mubr.msk.f32.vlgmr.msra.gmra.mxu1 %vm110_vm3, %v969_v12  ;;  %vm1505_vm3 = vcmask 310272  }
0x1557   :  { %1674 = vmatpush3.msra.mxu1 %v1068_v11  ;;  %1681 = vmatprep.mubr.msk.f32.mxu1 %vm1840_vm0, %v1839_v0 }
0x1558   :  { %1675 = vmatprep.subr.mxu1 %v1839_v0 }
0x1559   :  { %1676 = vmatpush3.msra.mxu1 %v1067_v14 }
0x155a   :  { %1677 = vmatprep.subr.mxu1 %v1839_v0 }
0x155b   :  { %1678 = vmatpush3.msra.mxu1 %v1066_v15  ;;  %v1315_v15 = vld [vmem:[#allocation2 + $0xb8] sm:$0xff] }
0x155c   :  { %1679 = vmatprep.subr.mxu1 %v1839_v0 }
0x155d   :  { %1680 = vmatpush3.msra.mxu1 %v1065_v4  ;;  %v1314_v4 = vld [vmem:[#allocation2 + $0x78] sm:$0xff] }
0x155e   :  { %1682 = vmatmul.mubr.msk.f32.vlgmr.msra.gmra.mxu1 %vm1084_vm10, %v1083_v16  ;;  %1684 = vmatprep.subr.mxu1 %v1839_v0  ;;  %v1313_v16 = vld [vmem:[#allocation2 + $0x38] sm:$0xff] }
0x155f   :  { %1694 = vmatprep.mubr.msk.f32.mxu1 %vm1840_vm0, %v1839_v0  ;;  %1685 = vmatpush3.msra.mxu1 %v1074_v17  ;;  %v1312_v17 = vld [vmem:[#allocation2 + $0x171] ss:$0 sm:$0xff] }
0x1560   :  { %1686 = vmatprep.subr.mxu1 %v1839_v0 }
0x1561   :  { %1687 = vmatpush3.msra.mxu1 %v1073_v18 }
0x1562   :  { %1688 = vmatprep.subr.mxu1 %v1839_v0 }
0x1563   :  { %1689 = vmatpush3.msra.mxu1 %v1072_v19 }
0x1564   :  { %1690 = vmatprep.subr.mxu1 %v1839_v0 }
0x1565   :  { %1691 = vmatpush3.msra.mxu1 %v1071_v20 }
0x1566   :  { %1692 = vmatprep.subr.mxu1 %v1839_v0 }
0x1567   :  { %1693 = vmatpush3.msra.mxu1 %v1070_v21 }
0x1568   :  { %1710 = vmatprep.subr.mxu1 %v1839_v0 }
0x1616   :  { %v1038_v23 = vpop.f32.mrf.mxu1 }
0x1617   :  { %v2035_v24 = vadd.f32 %v1038_v23, %v966_v22  ;;  %v1323_v22 = vld [vmem:[#allocation2 + $0x2b8] ss:$0 sm:$0xff] }
0x1618   :  { %v1672_v25 = vpop.f32.mrf.mxu1 }
0x1619   :  { %v1042_v26 = vmul.f32 0.5, %v2035_v24 }
0x161b   :  { %v1043_v27 = vmul.f32 1.442695, %v1042_v26 }
0x161d   :  { %1812 = vpow2.f32 %v1043_v27 }
0x161e   :  { %v1153_v29 = vpop.f32.mrf.mxu1 }
0x161f   :  { %v1154_v30 = vadd.f32 %v1153_v29, %v1069_v28 }
0x1620   :  { %v1683_v31 = vpop.f32.mrf.mxu1 }
0x1621   :  { %v1157_v32 = vmax.f32 %v1154_v30, 0.0 }
0x1623   :  { %1695 = vmatmul.mubr.msk.f32.vlgmr.msra.gmra.mxu1 %vm1158_vm11, %v1157_v32 }
0x1624   :  { %1722 = vmatprep.mubr.msk.f32.mxu1 %vm1840_vm0, %v1839_v0  ;;  %1711 = vmatpush3.msk.msra.mxu1 %vm951_vm4, %v1311_v48 }
0x1625   :  { %1712 = vmatprep.subr.mxu1 %v1839_v0 }
0x162a   :  { %v1813_v33 = vpop.eup %1812 }
0x162b   :  { %1046 = vrot.lane.b32.xlu1 %v1813_v33, %s1845_s20 }
0x162f   :  { %1056 = vrot.lane.b32.xlu1 %v2035_v24, %s1845_s20 }
0x1633   :  { %1328 = vrot.lane.b32.xlu1 %v1885_v5, %s1846_s21 }
0x1637   :  { %1335 = vrot.lane.b32.xlu1 %v1885_v5, %s1847_s22 }
0x163b   :  { %1501 = vrot.lane.b32.xlu1 %v2017_v2, %s1848_s23 }
0x169d   :  { %v1047_v39 = vpop.permute.xlu1 %1046 }
0x169e   :  { %v1049_v40 = vmul.f32 %v1047_v39, %v1885_v5  ;;  %v1310_v5 = vld [vmem:[#allocation2 + $0x130] sm:$0xff] }
0x169f   :  { %1713 = vmatpush3.msra.mxu1 %v1310_v5 }
0x16a0   :  { %1051 = vrot.lane.b32.xlu0 %v1049_v40, %s1849_s24  ;;  %1714 = vmatprep.subr.mxu1 %v1839_v0 }
0x16a1   :  { %1715 = vmatpush3.msra.mxu1 %v1309_v49  ;;  %v1057_v63 = vpop.permute.xlu1 %1056 }
0x16a2   :  { %1716 = vmatprep.subr.mxu1 %v1839_v0 }
0x16a3   :  { %1717 = vmatpush3.msra.mxu1 %v1308_v50 }
0x16a4   :  { %1718 = vmatprep.subr.mxu1 %v1839_v0 }
0x16a5   :  { %1719 = vmatpush3.msra.mxu1 %v1307_v51  ;;  %v1329_v8 = vpop.permute.xlu1 %1328 }
0x16a6   :  { %1720 = vmatprep.subr.mxu1 %v1839_v0 }
0x16a7   :  { %1721 = vmatpush3.msra.mxu1 %v1306_v52 }
0x16a9   :  { %v1336_v11 = vpop.permute.xlu1 %1335 }
0x16ad   :  { %v1502_v28 = vpop.permute.xlu1 %1501 }
0x16e3   :  { %v1228_v42 = vpop.f32.mrf.mxu1 }
0x16e4   :  { %v1229_v43 = vadd.f32 %v1228_v42, %v1075_v41 }
0x16e5   :  { %v1696_v44 = vpop.f32.mrf.mxu1 }
0x16e6   :  { %v1232_v45 = vmax.f32 %v1229_v43, 0.0 }
0x16e8   :  { %1708 = vmatmul.mubr.msk.f32.vlgmr.msra.gmra.mxu0 %vm1158_vm11, %v1232_v45 }
0x16e9   :  { %1745 = vmatprep.mubr.msk.f32.mxu0 %vm1840_vm0, %v1839_v0  ;;  %1726 = vmatpush3.msra.mxu0 %v1322_v53  ;;  %vm1345_vm0 = vcmask 334848  }
0x16ea   :  { %1727 = vmatprep.subr.mxu0 %v1839_v0 }
0x16eb   :  { %1728 = vmatpush3.msra.mxu0 %v1321_v54 }
0x16ec   :  { %1729 = vmatprep.subr.mxu0 %v1839_v0 }
0x16ed   :  { %1730 = vmatpush3.msra.mxu0 %v1320_v55 }
0x16ee   :  { %1731 = vmatprep.subr.mxu0 %v1839_v0 }
0x16ef   :  { %1732 = vmatpush3.msra.mxu0 %v1319_v56 }
0x16f0   :  { %1733 = vmatprep.subr.mxu0 %v1839_v0 }
0x16f1   :  { %1734 = vmatpush3.msra.mxu0 %v1318_v58 }
0x16f2   :  { %1735 = vmatprep.subr.mxu0 %v1839_v0 }
0x16f3   :  { %1736 = vmatpush3.msra.mxu0 %v1317_v60 }
0x16f4   :  { %1737 = vmatprep.subr.mxu0 %v1839_v0 }
0x16f5   :  { %1738 = vmatpush3.msra.mxu0 %v1316_v6 }
0x16f6   :  { %1739 = vmatprep.subr.mxu0 %v1839_v0 }
0x16f7   :  { %1740 = vmatpush3.msra.mxu0 %v1315_v15 }
0x16f8   :  { %1741 = vmatprep.subr.mxu0 %v1839_v0 }
0x16f9   :  { %1742 = vmatpush3.msra.mxu0 %v1314_v4 }
0x16fa   :  { %1743 = vmatprep.subr.mxu0 %v1839_v0 }
0x16fb   :  { %1744 = vmatpush3.msra.mxu0 %v1313_v16 }
0x1712   :  { %v1052_v46 = vpop.permute.xlu0 %1051 }
0x1713   :  { %v1054_v47 = vadd.f32 %v1052_v46, %v2035_v24 }
0x1715   :  { %1325 = vrot.lane.b32.xlu0 %v1054_v47, %s1850_s25  ;;  %v1060_v1 = vsel %vm1059_vm12, %v1054_v47, %v1057_v63 }
0x1716   :  { %v1062_v3 = vrot.slane %v1060_v1, 7 }
0x1718   :  { %v1064_v9 = vsel %vm951_vm4, 0.0, %v1062_v3  ;;  %vm1507_vm4 = vcmask 441344  }
0x1787   :  { %v1326_v7 = vpop.permute.xlu0 %1325 }
0x1788   :  { %v1338_v13 = vsel %vm32_vm2, %v1064_v9, %v1326_v7 }
0x1789   :  { %v1340_v10 = vsel %vm1339_vm13, %v1338_v13, %v1329_v8 }
0x17a8   :  { %v1302_v59 = vpop.f32.mrf.mxu0 }
0x17a9   :  { %v1303_v61 = vadd.f32 %v1302_v59, %v1081_v57 }
0x17aa   :  { %v1709_v62 = vpop.f32.mrf.mxu0 }
0x17ab   :  { %1332 = vrot.lane.b32.xlu0 %v1303_v61, %s1851_s26 }
0x181d   :  { %v1333_v2 = vpop.permute.xlu0 %1332 }
0x181e   :  { %v1342_v12 = vsel %vm1341_vm14, %v1340_v10, %v1333_v2 }
0x181f   :  { %v1344_v14 = vsel %vm1343_vm15, %v1342_v12, %v1336_v11 }
0x1820   :  { %1723 = vmatmul.mubr.msk.f32.vlgmr.msra.gmra.mxu1 %vm1345_vm0, %v1344_v14 }
0x18e0   :  { %v1418_v18 = vpop.f32.mrf.mxu1 }
0x18e1   :  { %v1419_v19 = vadd.f32 %v1418_v18, %v1312_v17 }
0x18e2   :  { %v1724_v20 = vpop.f32.mrf.mxu1 }
0x18e3   :  { %v1422_v21 = vmax.f32 %v1419_v19, 0.0 }
0x18e5   :  { %1746 = vmatmul.mubr.msk.f32.vlgmr.msra.gmra.mxu0 %vm1423_vm1, %v1422_v21 }
0x19a5   :  { %v1493_v23 = vpop.f32.mrf.mxu0 }
0x19a6   :  { %v1494_v25 = vadd.f32 %v1493_v23, %v1323_v22 }
0x19a7   :  { %v1747_v26 = vpop.f32.mrf.mxu0 }
0x19a8   :  { %1498 = vrot.lane.b32.xlu0 %v1494_v25, %s1850_s25 }
0x1a1a   :  { %v1499_v27 = vpop.permute.xlu0 %1498 }
0x1a1b   :  { %v1504_v0 = vsel %vm32_vm2, %v2035_v24, %v1499_v27 }
0x1a1c   :  { %v1506_v29 = vsel %vm1505_vm3, %v1504_v0, %v1502_v28 }
0x1a1d   :  { %1508 = vst.msk [vmem:[%s2081_s2] sm:$0xff] %vm1507_vm4, %v1506_v29 }
0x1a1e   :  { %1513 = vsyncpa [#allocation3], 1 }

</bundles_post_ra>
